<compile_context>
chip_gen: v7x
topology: tpu7x:2x2x1
jax: 0.10.0
libtpu: 0.0.40
codegen_flags: <defaults>
</compile_context>

<pallas_src>
import functools

import jax
import jax.numpy as jnp
from jax.experimental import pallas as pl
from jax.experimental.pallas import tpu as pltpu

LANE = 128
SUBLANE = 8


def _round_up(n, m):
    return ((n + m - 1) // m) * m


def _images_per_step(batch, nb_max=8):
    """Largest divisor of `batch` that is <= nb_max while keeping >= 2 grid
    steps (so both v7x TensorCores get work) whenever batch >= 2."""
    cap = max(1, min(nb_max, batch if batch < 2 else batch // 2))
    nb = 1
    for d in range(1, cap + 1):
        if batch % d == 0:
            nb = d
    return nb


# ----------------------------------------------------------------------------
# Pallas kernels
# ----------------------------------------------------------------------------
def _conv_pool_kernel(p0_ref, p1_ref, p2_ref, p3_ref, w_ref, b_ref, o_ref, *,
                      cout: int):
    """Fused conv(matmul)+bias+ReLU+2x2 max-pool for `nb` images.

    p*_ref: (nb, Hp*Wp, Kp) bf16 quadrant im2col patches (one per 2x2 pool
    window position); w_ref: (Kp, Np) bf16; b_ref: (1, Np) f32;
    o_ref: (nb, Hp*Wp, cout) bf16 (real channels only)."""
    w = w_ref[...]
    b = b_ref[...]

    def conv(p_ref):
        return jnp.einsum("bmk,kn->bmn", p_ref[...], w,
                          preferred_element_type=jnp.float32) + b

    m = jnp.maximum(jnp.maximum(conv(p0_ref), conv(p1_ref)),
                    jnp.maximum(conv(p2_ref), conv(p3_ref)))
    m = jnp.maximum(m, 0.0)                       # relu(max) == max(relu)
    o_ref[...] = m[:, :, :cout].astype(o_ref.dtype)


def _fc_head_kernel(x_ref, w1_ref, b1_ref, w2_ref, b2_ref, w3_ref, b3_ref,
                    o_ref):
    """Fused classifier head: relu(x@w1+b1) -> relu(.@w2+b2) -> .@w3+b3.
    Intermediates never leave VMEM."""
    h = jnp.dot(x_ref[...], w1_ref[...], preferred_element_type=jnp.float32)
    h = jnp.maximum(h + b1_ref[...], 0.0)
    h = jnp.dot(h.astype(w2_ref.dtype), w2_ref[...],
                preferred_element_type=jnp.float32)
    h = jnp.maximum(h + b2_ref[...], 0.0)
    h = jnp.dot(h.astype(w3_ref.dtype), w3_ref[...],
                preferred_element_type=jnp.float32)
    o_ref[...] = (h + b3_ref[...]).astype(o_ref.dtype)


# ----------------------------------------------------------------------------
# Trace-level glue: quadrant im2col (single pass, bf16, K-pad folded in)
# ----------------------------------------------------------------------------
def _pool_quadrant_patches(x, kh, kw):
    """x: (B, H, W, Cin) bf16.  Returns 4 quadrant patch matrices
    [(B, Hp*Wp, Kp)] for pool offsets (di,dj) in (0,0),(0,1),(1,0),(1,1),
    with feature order (kh, kw, Cin) and K zero-padded to a lane multiple."""
    B, H, W, Cin = x.shape
    Ho, Wo = H - kh + 1, W - kw + 1
    Hp, Wp = Ho // 2, Wo // 2
    K = kh * kw * Cin
    Kp = _round_up(K, LANE)
    kpad = [jnp.zeros((B, Hp, Wp, Kp - K), dtype=x.dtype)] if Kp > K else []
    quads = []
    for di in range(2):
        for dj in range(2):
            cols = [x[:, di + i: di + i + 2 * Hp: 2,
                       dj + j: dj + j + 2 * Wp: 2, :]
                    for i in range(kh) for j in range(kw)]
            q = jnp.concatenate(cols + kpad, axis=-1)        # (B,Hp,Wp,Kp)
            quads.append(q.reshape(B, Hp * Wp, Kp))
    return quads, Hp, Wp, Kp


# ----------------------------------------------------------------------------
# Pallas wrappers
# ----------------------------------------------------------------------------
def conv_relu_pool(x, w, b, *, nb_max: int = 8):
    """Fused valid conv (stride 1) + bias + ReLU + 2x2/stride-2 max-pool.

    x: (B, H, W, Cin) (f32 or bf16, channels-last); w: (Cout, Cin, kh, kw)
    [PyTorch layout]; b: (Cout,).  Returns (B, Ho//2, Wo//2, Cout) bf16."""
    B, H, W, Cin = x.shape
    Cout, Cin2, kh, kw = w.shape
    assert Cin == Cin2
    K = kh * kw * Cin
    Np = _round_up(Cout, LANE)

    quads, Hp, Wp, Kp = _pool_quadrant_patches(x.astype(jnp.bfloat16), kh, kw)
    HW = Hp * Wp
    # Weight flatten matching the (kh, kw, Cin) patch feature order.
    wmat = jnp.pad(
        w.transpose(2, 3, 1, 0).reshape(K, Cout).astype(jnp.bfloat16),
        ((0, Kp - K), (0, Np - Cout)))
    bvec = jnp.pad(b.astype(jnp.float32), (0, Np - Cout)).reshape(1, Np)

    nb = _images_per_step(B, nb_max)
    kernel = functools.partial(_conv_pool_kernel, cout=Cout)
    out = pl.pallas_call(
        kernel,
        out_shape=jax.ShapeDtypeStruct((B, HW, Cout), jnp.bfloat16),
        grid=(B // nb,),
        in_specs=[pl.BlockSpec((nb, HW, Kp), lambda i: (i, 0, 0))] * 4 + [
            pl.BlockSpec((Kp, Np), lambda i: (0, 0)),
            pl.BlockSpec((1, Np), lambda i: (0, 0)),
        ],
        out_specs=pl.BlockSpec((nb, HW, Cout), lambda i: (i, 0, 0)),
        compiler_params=pltpu.CompilerParams(
            dimension_semantics=("parallel",)),
    )(*quads, wmat, bvec)
    return out.reshape(B, Hp, Wp, Cout)


def fc_head(x, w1, b1, w2, b2, w3, b3, tb_max: int = 1024):
    """Fused fc1(+ReLU) -> fc2(+ReLU) -> fc3 in a single pallas_call.

    x:(B,K); w_i are PyTorch-layout (out, in).  All widths zero-padded to 128
    lanes (padded lanes stay exactly zero); operands bf16, f32 accumulation."""
    B, K = x.shape
    N1, K1 = w1.shape
    N2, K2 = w2.shape
    N3, K3 = w3.shape
    assert K1 == K and K2 == N1 and K3 == N2
    Kp = _round_up(K, LANE)
    N1p, N2p, N3p = (_round_up(n, LANE) for n in (N1, N2, N3))
    # Aim for >= 2 grid steps once B is large enough (v7x megacore).
    tb = min(tb_max, _round_up(max(SUBLANE, -(-B // 2)), SUBLANE))
    Bp = _round_up(B, tb)

    xp = jnp.pad(x.astype(jnp.bfloat16), ((0, Bp - B), (0, Kp - K)))
    w1p = jnp.pad(w1.T.astype(jnp.bfloat16), ((0, Kp - K), (0, N1p - N1)))
    w2p = jnp.pad(w2.T.astype(jnp.bfloat16), ((0, N1p - N1), (0, N2p - N2)))
    w3p = jnp.pad(w3.T.astype(jnp.bfloat16), ((0, N2p - N2), (0, N3p - N3)))
    b1p = jnp.pad(b1.astype(jnp.float32), (0, N1p - N1)).reshape(1, N1p)
    b2p = jnp.pad(b2.astype(jnp.float32), (0, N2p - N2)).reshape(1, N2p)
    b3p = jnp.pad(b3.astype(jnp.float32), (0, N3p - N3)).reshape(1, N3p)

    out = pl.pallas_call(
        _fc_head_kernel,
        out_shape=jax.ShapeDtypeStruct((Bp, N3p), jnp.float32),
        grid=(Bp // tb,),
        in_specs=[
            pl.BlockSpec((tb, Kp), lambda i: (i, 0)),
            pl.BlockSpec((Kp, N1p), lambda i: (0, 0)),
            pl.BlockSpec((1, N1p), lambda i: (0, 0)),
            pl.BlockSpec((N1p, N2p), lambda i: (0, 0)),
            pl.BlockSpec((1, N2p), lambda i: (0, 0)),
            pl.BlockSpec((N2p, N3p), lambda i: (0, 0)),
            pl.BlockSpec((1, N3p), lambda i: (0, 0)),
        ],
        out_specs=pl.BlockSpec((tb, N3p), lambda i: (i, 0)),
        compiler_params=pltpu.CompilerParams(
            dimension_semantics=("parallel",)),
    )(xp, w1p, b1p, w2p, b2p, w3p, b3p)
    return out[:B, :N3]


# ----------------------------------------------------------------------------
# Parameter init (deterministic, PyTorch-style uniform +/- 1/sqrt(fan_in))
# ----------------------------------------------------------------------------
def init_params(key):
    def u(key, shape, fan_in):
        bound = 1.0 / jnp.sqrt(fan_in)
        return jax.random.uniform(key, shape, jnp.float32, -bound, bound)

    keys = jax.random.split(key, 10)
    return {
        "conv1_w": u(keys[0], (6, 3, 5, 5), 3 * 5 * 5),
        "conv1_b": u(keys[1], (6,), 3 * 5 * 5),
        "conv2_w": u(keys[2], (16, 6, 5, 5), 6 * 5 * 5),
        "conv2_b": u(keys[3], (16,), 6 * 5 * 5),
        "fc1_w": u(keys[4], (120, 400), 400),
        "fc1_b": u(keys[5], (120,), 400),
        "fc2_w": u(keys[6], (84, 120), 120),
        "fc2_b": u(keys[7], (84,), 120),
        "fc3_w": u(keys[8], (10, 84), 84),
        "fc3_b": u(keys[9], (10,), 84),
    }


# ----------------------------------------------------------------------------
# Forward pass (matches ConvNet.forward)
# ----------------------------------------------------------------------------
def convnet_forward(params, x):
    # x: (B, 3, 32, 32) NCHW (PyTorch convention); go channels-last once.
    B = x.shape[0]
    h = jnp.transpose(x, (0, 2, 3, 1))                               # (B,32,32,3)
    h = conv_relu_pool(h, params["conv1_w"], params["conv1_b"])      # (B,14,14,6) bf16
    h = conv_relu_pool(h, params["conv2_w"], params["conv2_b"])      # (B,5,5,16)  bf16
    x_flat = h.reshape(B, 5 * 5 * 16)                                # (B,400) in (h,w,c) order
    # PyTorch's view(-1, 400) flattens in (c,h,w) order; permute fc1's weight
    # columns once (trace-time, constant-folded) to match our (h,w,c) flatten.
    w1 = params["fc1_w"].reshape(120, 16, 5, 5).transpose(0, 2, 3, 1).reshape(120, 400)
    return fc_head(x_flat, w1, params["fc1_b"],
                   params["fc2_w"], params["fc2_b"],
                   params["fc3_w"], params["fc3_b"])                 # (B,10)


# ----------------------------------------------------------------------------
# Pure-JAX reference (f32, lax.conv) to validate the bf16 Pallas path
# ----------------------------------------------------------------------------
def reference_forward(params, x):
    def conv(h, w, b):
        o = jax.lax.conv_general_dilated(
            h, w, (1, 1), "VALID", dimension_numbers=("NCHW", "OIHW", "NCHW"))
        return jax.nn.relu(o + b[None, :, None, None])

    h = conv(x, params["conv1_w"], params["conv1_b"])
    h = jax.lax.reduce_window(h, -jnp.inf, jax.lax.max,
                              (1, 1, 2, 2), (1, 1, 2, 2), "VALID")
    h = conv(h, params["conv2_w"], params["conv2_b"])
    h = jax.lax.reduce_window(h, -jnp.inf, jax.lax.max,
                              (1, 1, 2, 2), (1, 1, 2, 2), "VALID")
    h = h.reshape(x.shape[0], -1)                     # (c,h,w) flatten, PyTorch order
    h = jax.nn.relu(h @ params["fc1_w"].T + params["fc1_b"])
    h = jax.nn.relu(h @ params["fc2_w"].T + params["fc2_b"])
    return h @ params["fc3_w"].T + params["fc3_b"]


if __name__ == "__main__":
    key = jax.random.PRNGKey(0)
    pkey, xkey = jax.random.split(key)
    params = init_params(pkey)
    # Input must be 32x32 so that the flatten produces 16*5*5 = 400 features.
    x = jax.random.normal(xkey, (2, 3, 32, 32), dtype=jnp.float32)

    out = jax.jit(convnet_forward)(params, x)
    out = jax.block_until_ready(out)
    assert out.shape == (2, 10) and out.dtype == jnp.float32

    ref = reference_forward(params, x)
    err = float(jnp.max(jnp.abs(out - ref)))
    assert jnp.allclose(out, ref, atol=1e-1, rtol=1e-1), f"max abs err {err}"

    print("KERNEL_OK")
</pallas_src>

<mosaic_0001>
module attributes {stable_mosaic.version = 11 : i64} {
  func.func @_conv_pool_kernel(%arg0: i32, %arg1: memref<1x196x128xbf16, #tpu.memory_space<vmem>>, %arg2: memref<1x196x128xbf16, #tpu.memory_space<vmem>>, %arg3: memref<1x196x128xbf16, #tpu.memory_space<vmem>>, %arg4: memref<1x196x128xbf16, #tpu.memory_space<vmem>>, %arg5: memref<128x128xbf16, #tpu.memory_space<vmem>>, %arg6: memref<1x128xf32, #tpu.memory_space<vmem>>, %arg7: memref<1x196x6xbf16, #tpu.memory_space<vmem>>) attributes {dimension_semantics = [#tpu.dimension_semantics<parallel>], iteration_bounds = array<i64: 2>, scalar_prefetch = 0 : i64, scratch_operands = 0 : i64, tpu.core_type = #tpu.core_type<tc>, window_params = [{transform_indices = @transform_0, window_bounds = array<i64: 1, 196, 128>}, {transform_indices = @transform_1, window_bounds = array<i64: 1, 196, 128>}, {transform_indices = @transform_2, window_bounds = array<i64: 1, 196, 128>}, {transform_indices = @transform_3, window_bounds = array<i64: 1, 196, 128>}, {pipeline_mode = #tpu.pipeline_mode<synchronous>, transform_indices = @transform_4, window_bounds = array<i64: 128, 128>}, {pipeline_mode = #tpu.pipeline_mode<synchronous>, transform_indices = @transform_5, window_bounds = array<i64: 1, 128>}, {transform_indices = @transform_6, window_bounds = array<i64: 1, 196, 6>}]} {
    %c0 = arith.constant 0 : index
    %c0_0 = arith.constant 0 : index
    %0 = vector.load %arg5[%c0, %c0_0] : memref<128x128xbf16, #tpu.memory_space<vmem>>, vector<128x128xbf16>
    %c0_1 = arith.constant 0 : index
    %c0_2 = arith.constant 0 : index
    %1 = vector.load %arg6[%c0_1, %c0_2] : memref<1x128xf32, #tpu.memory_space<vmem>>, vector<1x128xf32>
    %c0_3 = arith.constant 0 : index
    %c0_4 = arith.constant 0 : index
    %c0_5 = arith.constant 0 : index
    %2 = vector.load %arg1[%c0_3, %c0_4, %c0_5] : memref<1x196x128xbf16, #tpu.memory_space<vmem>>, vector<1x196x128xbf16>
    "tpu.trace_start"() <{level = 10 : i32, message = "bmk,kn->bmn"}> : () -> ()
    %cst = arith.constant dense<0.000000e+00> : vector<1x196x128xf32>
    %3 = tpu.matmul %2, %0, %cst {dimension_numbers = #tpu.dot_dimension_numbers<[2], [0], [0, 1], [1], [0, 0, 0, 1, 1, 1], [], []>} : vector<1x196x128xbf16>, vector<128x128xbf16>, vector<1x196x128xf32> -> vector<1x196x128xf32>
    "tpu.trace_stop"() : () -> ()
    %4 = vector.shape_cast %1 : vector<1x128xf32> to vector<1x1x128xf32>
    %5 = vector.broadcast %4 : vector<1x1x128xf32> to vector<1x196x128xf32>
    %6 = arith.addf %3, %5 : vector<1x196x128xf32>
    %c0_6 = arith.constant 0 : index
    %c0_7 = arith.constant 0 : index
    %c0_8 = arith.constant 0 : index
    %7 = vector.load %arg2[%c0_6, %c0_7, %c0_8] : memref<1x196x128xbf16, #tpu.memory_space<vmem>>, vector<1x196x128xbf16>
    "tpu.trace_start"() <{level = 10 : i32, message = "bmk,kn->bmn"}> : () -> ()
    %cst_9 = arith.constant dense<0.000000e+00> : vector<1x196x128xf32>
    %8 = tpu.matmul %7, %0, %cst_9 {dimension_numbers = #tpu.dot_dimension_numbers<[2], [0], [0, 1], [1], [0, 0, 0, 1, 1, 1], [], []>} : vector<1x196x128xbf16>, vector<128x128xbf16>, vector<1x196x128xf32> -> vector<1x196x128xf32>
    "tpu.trace_stop"() : () -> ()
    %9 = vector.shape_cast %1 : vector<1x128xf32> to vector<1x1x128xf32>
    %10 = vector.broadcast %9 : vector<1x1x128xf32> to vector<1x196x128xf32>
    %11 = arith.addf %8, %10 : vector<1x196x128xf32>
    %12 = arith.maximumf %6, %11 : vector<1x196x128xf32>
    %c0_10 = arith.constant 0 : index
    %c0_11 = arith.constant 0 : index
    %c0_12 = arith.constant 0 : index
    %13 = vector.load %arg3[%c0_10, %c0_11, %c0_12] : memref<1x196x128xbf16, #tpu.memory_space<vmem>>, vector<1x196x128xbf16>
    "tpu.trace_start"() <{level = 10 : i32, message = "bmk,kn->bmn"}> : () -> ()
    %cst_13 = arith.constant dense<0.000000e+00> : vector<1x196x128xf32>
    %14 = tpu.matmul %13, %0, %cst_13 {dimension_numbers = #tpu.dot_dimension_numbers<[2], [0], [0, 1], [1], [0, 0, 0, 1, 1, 1], [], []>} : vector<1x196x128xbf16>, vector<128x128xbf16>, vector<1x196x128xf32> -> vector<1x196x128xf32>
    "tpu.trace_stop"() : () -> ()
    %15 = vector.shape_cast %1 : vector<1x128xf32> to vector<1x1x128xf32>
    %16 = vector.broadcast %15 : vector<1x1x128xf32> to vector<1x196x128xf32>
    %17 = arith.addf %14, %16 : vector<1x196x128xf32>
    %c0_14 = arith.constant 0 : index
    %c0_15 = arith.constant 0 : index
    %c0_16 = arith.constant 0 : index
    %18 = vector.load %arg4[%c0_14, %c0_15, %c0_16] : memref<1x196x128xbf16, #tpu.memory_space<vmem>>, vector<1x196x128xbf16>
    "tpu.trace_start"() <{level = 10 : i32, message = "bmk,kn->bmn"}> : () -> ()
    %cst_17 = arith.constant dense<0.000000e+00> : vector<1x196x128xf32>
    %19 = tpu.matmul %18, %0, %cst_17 {dimension_numbers = #tpu.dot_dimension_numbers<[2], [0], [0, 1], [1], [0, 0, 0, 1, 1, 1], [], []>} : vector<1x196x128xbf16>, vector<128x128xbf16>, vector<1x196x128xf32> -> vector<1x196x128xf32>
    "tpu.trace_stop"() : () -> ()
    %20 = vector.shape_cast %1 : vector<1x128xf32> to vector<1x1x128xf32>
    %21 = vector.broadcast %20 : vector<1x1x128xf32> to vector<1x196x128xf32>
    %22 = arith.addf %19, %21 : vector<1x196x128xf32>
    %23 = arith.maximumf %17, %22 : vector<1x196x128xf32>
    %24 = arith.maximumf %12, %23 : vector<1x196x128xf32>
    %cst_18 = arith.constant 0.000000e+00 : f32
    %25 = vector.broadcast %cst_18 : f32 to vector<1x196x128xf32>
    %26 = arith.maximumf %24, %25 : vector<1x196x128xf32>
    %27 = vector.extract_strided_slice %26 {offsets = [0, 0, 0], sizes = [1, 196, 6], strides = [1, 1, 1]} : vector<1x196x128xf32> to vector<1x196x6xf32>
    %28 = arith.truncf %27 : vector<1x196x6xf32> to vector<1x196x6xbf16>
    %c0_19 = arith.constant 0 : index
    %c0_20 = arith.constant 0 : index
    %c0_21 = arith.constant 0 : index
    %29 = vector.load %arg7[%c0_19, %c0_20, %c0_21] : memref<1x196x6xbf16, #tpu.memory_space<vmem>>, vector<1x196x6xbf16>
    tpu.vector_store %arg7[%c0_19, %c0_20, %c0_21], %28 {strides = array<i32>} : memref<1x196x6xbf16, #tpu.memory_space<vmem>>, vector<1x196x6xbf16>,
    return
  }
  func.func @transform_0(%arg0: i32) -> (i32, i32, i32) {
    %c0_i32 = arith.constant 0 : i32
    %c0_i32_0 = arith.constant 0 : i32
    %c0_i32_1 = arith.constant 0 : i32
    return %arg0, %c0_i32, %c0_i32_0 : i32, i32, i32
  }
  func.func @transform_1(%arg0: i32) -> (i32, i32, i32) {
    %c0_i32 = arith.constant 0 : i32
    %c0_i32_0 = arith.constant 0 : i32
    %c0_i32_1 = arith.constant 0 : i32
    return %arg0, %c0_i32, %c0_i32_0 : i32, i32, i32
  }
  func.func @transform_2(%arg0: i32) -> (i32, i32, i32) {
    %c0_i32 = arith.constant 0 : i32
    %c0_i32_0 = arith.constant 0 : i32
    %c0_i32_1 = arith.constant 0 : i32
    return %arg0, %c0_i32, %c0_i32_0 : i32, i32, i32
  }
  func.func @transform_3(%arg0: i32) -> (i32, i32, i32) {
    %c0_i32 = arith.constant 0 : i32
    %c0_i32_0 = arith.constant 0 : i32
    %c0_i32_1 = arith.constant 0 : i32
    return %arg0, %c0_i32, %c0_i32_0 : i32, i32, i32
  }
  func.func @transform_4(%arg0: i32) -> (i32, i32) {
    %c0_i32 = arith.constant 0 : i32
    %c0_i32_0 = arith.constant 0 : i32
    %c0_i32_1 = arith.constant 0 : i32
    return %c0_i32, %c0_i32_0 : i32, i32
  }
  func.func @transform_5(%arg0: i32) -> (i32, i32) {
    %c0_i32 = arith.constant 0 : i32
    %c0_i32_0 = arith.constant 0 : i32
    %c0_i32_1 = arith.constant 0 : i32
    return %c0_i32, %c0_i32_0 : i32, i32
  }
  func.func @transform_6(%arg0: i32) -> (i32, i32, i32) {
    %c0_i32 = arith.constant 0 : i32
    %c0_i32_0 = arith.constant 0 : i32
    %c0_i32_1 = arith.constant 0 : i32
    return %arg0, %c0_i32, %c0_i32_0 : i32, i32, i32
  }
}

module attributes {stable_mosaic.version = 11 : i64} {
  func.func @_conv_pool_kernel(%arg0: i32, %arg1: memref<1x25x256xbf16, #tpu.memory_space<vmem>>, %arg2: memref<1x25x256xbf16, #tpu.memory_space<vmem>>, %arg3: memref<1x25x256xbf16, #tpu.memory_space<vmem>>, %arg4: memref<1x25x256xbf16, #tpu.memory_space<vmem>>, %arg5: memref<256x128xbf16, #tpu.memory_space<vmem>>, %arg6: memref<1x128xf32, #tpu.memory_space<vmem>>, %arg7: memref<1x25x16xbf16, #tpu.memory_space<vmem>>) attributes {dimension_semantics = [#tpu.dimension_semantics<parallel>], iteration_bounds = array<i64: 2>, scalar_prefetch = 0 : i64, scratch_operands = 0 : i64, tpu.core_type = #tpu.core_type<tc>, window_params = [{transform_indices = @transform_0, window_bounds = array<i64: 1, 25, 256>}, {transform_indices = @transform_1, window_bounds = array<i64: 1, 25, 256>}, {transform_indices = @transform_2, window_bounds = array<i64: 1, 25, 256>}, {transform_indices = @transform_3, window_bounds = array<i64: 1, 25, 256>}, {pipeline_mode = #tpu.pipeline_mode<synchronous>, transform_indices = @transform_4, window_bounds = array<i64: 256, 128>}, {pipeline_mode = #tpu.pipeline_mode<synchronous>, transform_indices = @transform_5, window_bounds = array<i64: 1, 128>}, {transform_indices = @transform_6, window_bounds = array<i64: 1, 25, 16>}]} {
    %c0 = arith.constant 0 : index
    %c0_0 = arith.constant 0 : index
    %0 = vector.load %arg5[%c0, %c0_0] : memref<256x128xbf16, #tpu.memory_space<vmem>>, vector<256x128xbf16>
    %c0_1 = arith.constant 0 : index
    %c0_2 = arith.constant 0 : index
    %1 = vector.load %arg6[%c0_1, %c0_2] : memref<1x128xf32, #tpu.memory_space<vmem>>, vector<1x128xf32>
    %c0_3 = arith.constant 0 : index
    %c0_4 = arith.constant 0 : index
    %c0_5 = arith.constant 0 : index
    %2 = vector.load %arg1[%c0_3, %c0_4, %c0_5] : memref<1x25x256xbf16, #tpu.memory_space<vmem>>, vector<1x25x256xbf16>
    "tpu.trace_start"() <{level = 10 : i32, message = "bmk,kn->bmn"}> : () -> ()
    %cst = arith.constant dense<0.000000e+00> : vector<1x25x128xf32>
    %3 = tpu.matmul %2, %0, %cst {dimension_numbers = #tpu.dot_dimension_numbers<[2], [0], [0, 1], [1], [0, 0, 0, 1, 1, 1], [], []>} : vector<1x25x256xbf16>, vector<256x128xbf16>, vector<1x25x128xf32> -> vector<1x25x128xf32>
    "tpu.trace_stop"() : () -> ()
    %4 = vector.shape_cast %1 : vector<1x128xf32> to vector<1x1x128xf32>
    %5 = vector.broadcast %4 : vector<1x1x128xf32> to vector<1x25x128xf32>
    %6 = arith.addf %3, %5 : vector<1x25x128xf32>
    %c0_6 = arith.constant 0 : index
    %c0_7 = arith.constant 0 : index
    %c0_8 = arith.constant 0 : index
    %7 = vector.load %arg2[%c0_6, %c0_7, %c0_8] : memref<1x25x256xbf16, #tpu.memory_space<vmem>>, vector<1x25x256xbf16>
    "tpu.trace_start"() <{level = 10 : i32, message = "bmk,kn->bmn"}> : () -> ()
    %cst_9 = arith.constant dense<0.000000e+00> : vector<1x25x128xf32>
    %8 = tpu.matmul %7, %0, %cst_9 {dimension_numbers = #tpu.dot_dimension_numbers<[2], [0], [0, 1], [1], [0, 0, 0, 1, 1, 1], [], []>} : vector<1x25x256xbf16>, vector<256x128xbf16>, vector<1x25x128xf32> -> vector<1x25x128xf32>
    "tpu.trace_stop"() : () -> ()
    %9 = vector.shape_cast %1 : vector<1x128xf32> to vector<1x1x128xf32>
    %10 = vector.broadcast %9 : vector<1x1x128xf32> to vector<1x25x128xf32>
    %11 = arith.addf %8, %10 : vector<1x25x128xf32>
    %12 = arith.maximumf %6, %11 : vector<1x25x128xf32>
    %c0_10 = arith.constant 0 : index
    %c0_11 = arith.constant 0 : index
    %c0_12 = arith.constant 0 : index
    %13 = vector.load %arg3[%c0_10, %c0_11, %c0_12] : memref<1x25x256xbf16, #tpu.memory_space<vmem>>, vector<1x25x256xbf16>
    "tpu.trace_start"() <{level = 10 : i32, message = "bmk,kn->bmn"}> : () -> ()
    %cst_13 = arith.constant dense<0.000000e+00> : vector<1x25x128xf32>
    %14 = tpu.matmul %13, %0, %cst_13 {dimension_numbers = #tpu.dot_dimension_numbers<[2], [0], [0, 1], [1], [0, 0, 0, 1, 1, 1], [], []>} : vector<1x25x256xbf16>, vector<256x128xbf16>, vector<1x25x128xf32> -> vector<1x25x128xf32>
    "tpu.trace_stop"() : () -> ()
    %15 = vector.shape_cast %1 : vector<1x128xf32> to vector<1x1x128xf32>
    %16 = vector.broadcast %15 : vector<1x1x128xf32> to vector<1x25x128xf32>
    %17 = arith.addf %14, %16 : vector<1x25x128xf32>
    %c0_14 = arith.constant 0 : index
    %c0_15 = arith.constant 0 : index
    %c0_16 = arith.constant 0 : index
    %18 = vector.load %arg4[%c0_14, %c0_15, %c0_16] : memref<1x25x256xbf16, #tpu.memory_space<vmem>>, vector<1x25x256xbf16>
    "tpu.trace_start"() <{level = 10 : i32, message = "bmk,kn->bmn"}> : () -> ()
    %cst_17 = arith.constant dense<0.000000e+00> : vector<1x25x128xf32>
    %19 = tpu.matmul %18, %0, %cst_17 {dimension_numbers = #tpu.dot_dimension_numbers<[2], [0], [0, 1], [1], [0, 0, 0, 1, 1, 1], [], []>} : vector<1x25x256xbf16>, vector<256x128xbf16>, vector<1x25x128xf32> -> vector<1x25x128xf32>
    "tpu.trace_stop"() : () -> ()
    %20 = vector.shape_cast %1 : vector<1x128xf32> to vector<1x1x128xf32>
    %21 = vector.broadcast %20 : vector<1x1x128xf32> to vector<1x25x128xf32>
    %22 = arith.addf %19, %21 : vector<1x25x128xf32>
    %23 = arith.maximumf %17, %22 : vector<1x25x128xf32>
    %24 = arith.maximumf %12, %23 : vector<1x25x128xf32>
    %cst_18 = arith.constant 0.000000e+00 : f32
    %25 = vector.broadcast %cst_18 : f32 to vector<1x25x128xf32>
    %26 = arith.maximumf %24, %25 : vector<1x25x128xf32>
    %27 = vector.extract_strided_slice %26 {offsets = [0, 0, 0], sizes = [1, 25, 16], strides = [1, 1, 1]} : vector<1x25x128xf32> to vector<1x25x16xf32>
    %28 = arith.truncf %27 : vector<1x25x16xf32> to vector<1x25x16xbf16>
    %c0_19 = arith.constant 0 : index
    %c0_20 = arith.constant 0 : index
    %c0_21 = arith.constant 0 : index
    %29 = vector.load %arg7[%c0_19, %c0_20, %c0_21] : memref<1x25x16xbf16, #tpu.memory_space<vmem>>, vector<1x25x16xbf16>
    tpu.vector_store %arg7[%c0_19, %c0_20, %c0_21], %28 {strides = array<i32>} : memref<1x25x16xbf16, #tpu.memory_space<vmem>>, vector<1x25x16xbf16>,
    return
  }
  func.func @transform_0(%arg0: i32) -> (i32, i32, i32) {
    %c0_i32 = arith.constant 0 : i32
    %c0_i32_0 = arith.constant 0 : i32
    %c0_i32_1 = arith.constant 0 : i32
    return %arg0, %c0_i32, %c0_i32_0 : i32, i32, i32
  }
  func.func @transform_1(%arg0: i32) -> (i32, i32, i32) {
    %c0_i32 = arith.constant 0 : i32
    %c0_i32_0 = arith.constant 0 : i32
    %c0_i32_1 = arith.constant 0 : i32
    return %arg0, %c0_i32, %c0_i32_0 : i32, i32, i32
  }
  func.func @transform_2(%arg0: i32) -> (i32, i32, i32) {
    %c0_i32 = arith.constant 0 : i32
    %c0_i32_0 = arith.constant 0 : i32
    %c0_i32_1 = arith.constant 0 : i32
    return %arg0, %c0_i32, %c0_i32_0 : i32, i32, i32
  }
  func.func @transform_3(%arg0: i32) -> (i32, i32, i32) {
    %c0_i32 = arith.constant 0 : i32
    %c0_i32_0 = arith.constant 0 : i32
    %c0_i32_1 = arith.constant 0 : i32
    return %arg0, %c0_i32, %c0_i32_0 : i32, i32, i32
  }
  func.func @transform_4(%arg0: i32) -> (i32, i32) {
    %c0_i32 = arith.constant 0 : i32
    %c0_i32_0 = arith.constant 0 : i32
    %c0_i32_1 = arith.constant 0 : i32
    return %c0_i32, %c0_i32_0 : i32, i32
  }
  func.func @transform_5(%arg0: i32) -> (i32, i32) {
    %c0_i32 = arith.constant 0 : i32
    %c0_i32_0 = arith.constant 0 : i32
    %c0_i32_1 = arith.constant 0 : i32
    return %c0_i32, %c0_i32_0 : i32, i32
  }
  func.func @transform_6(%arg0: i32) -> (i32, i32, i32) {
    %c0_i32 = arith.constant 0 : i32
    %c0_i32_0 = arith.constant 0 : i32
    %c0_i32_1 = arith.constant 0 : i32
    return %arg0, %c0_i32, %c0_i32_0 : i32, i32, i32
  }
}

module attributes {stable_mosaic.version = 11 : i64} {
  func.func @_fc_head_kernel(%arg0: i32, %arg1: memref<8x512xbf16, #tpu.memory_space<vmem>>, %arg2: memref<512x128xbf16, #tpu.memory_space<vmem>>, %arg3: memref<1x128xf32, #tpu.memory_space<vmem>>, %arg4: memref<128x128xbf16, #tpu.memory_space<vmem>>, %arg5: memref<1x128xf32, #tpu.memory_space<vmem>>, %arg6: memref<128x128xbf16, #tpu.memory_space<vmem>>, %arg7: memref<1x128xf32, #tpu.memory_space<vmem>>, %arg8: memref<8x128xf32, #tpu.memory_space<vmem>>) attributes {dimension_semantics = [#tpu.dimension_semantics<parallel>], iteration_bounds = array<i64: 1>, scalar_prefetch = 0 : i64, scratch_operands = 0 : i64, tpu.core_type = #tpu.core_type<tc>, window_params = [{transform_indices = @transform_0, window_bounds = array<i64: 8, 512>}, {pipeline_mode = #tpu.pipeline_mode<synchronous>, transform_indices = @transform_1, window_bounds = array<i64: 512, 128>}, {pipeline_mode = #tpu.pipeline_mode<synchronous>, transform_indices = @transform_2, window_bounds = array<i64: 1, 128>}, {pipeline_mode = #tpu.pipeline_mode<synchronous>, transform_indices = @transform_3, window_bounds = array<i64: 128, 128>}, {pipeline_mode = #tpu.pipeline_mode<synchronous>, transform_indices = @transform_4, window_bounds = array<i64: 1, 128>}, {pipeline_mode = #tpu.pipeline_mode<synchronous>, transform_indices = @transform_5, window_bounds = array<i64: 128, 128>}, {pipeline_mode = #tpu.pipeline_mode<synchronous>, transform_indices = @transform_6, window_bounds = array<i64: 1, 128>}, {transform_indices = @transform_7, window_bounds = array<i64: 8, 128>}]} {
    %c0 = arith.constant 0 : index
    %c0_0 = arith.constant 0 : index
    %0 = vector.load %arg1[%c0, %c0_0] : memref<8x512xbf16, #tpu.memory_space<vmem>>, vector<8x512xbf16>
    %c0_1 = arith.constant 0 : index
    %c0_2 = arith.constant 0 : index
    %1 = vector.load %arg2[%c0_1, %c0_2] : memref<512x128xbf16, #tpu.memory_space<vmem>>, vector<512x128xbf16>
    %cst = arith.constant dense<0.000000e+00> : vector<8x128xf32>
    %2 = tpu.matmul %0, %1, %cst {dimension_numbers = #tpu.dot_dimension_numbers<[1], [0], [0], [1], [0, 0, 1, 1], [], []>} : vector<8x512xbf16>, vector<512x128xbf16>, vector<8x128xf32> -> vector<8x128xf32>
    %c0_3 = arith.constant 0 : index
    %c0_4 = arith.constant 0 : index
    %3 = vector.load %arg3[%c0_3, %c0_4] : memref<1x128xf32, #tpu.memory_space<vmem>>, vector<1x128xf32>
    %4 = vector.broadcast %3 : vector<1x128xf32> to vector<8x128xf32>
    %5 = arith.addf %2, %4 : vector<8x128xf32>
    %cst_5 = arith.constant 0.000000e+00 : f32
    %6 = vector.broadcast %cst_5 : f32 to vector<8x128xf32>
    %7 = arith.maximumf %5, %6 : vector<8x128xf32>
    %8 = arith.truncf %7 : vector<8x128xf32> to vector<8x128xbf16>
    %c0_6 = arith.constant 0 : index
    %c0_7 = arith.constant 0 : index
    %9 = vector.load %arg4[%c0_6, %c0_7] : memref<128x128xbf16, #tpu.memory_space<vmem>>, vector<128x128xbf16>
    %cst_8 = arith.constant dense<0.000000e+00> : vector<8x128xf32>
    %10 = tpu.matmul %8, %9, %cst_8 {dimension_numbers = #tpu.dot_dimension_numbers<[1], [0], [0], [1], [0, 0, 1, 1], [], []>} : vector<8x128xbf16>, vector<128x128xbf16>, vector<8x128xf32> -> vector<8x128xf32>
    %c0_9 = arith.constant 0 : index
    %c0_10 = arith.constant 0 : index
    %11 = vector.load %arg5[%c0_9, %c0_10] : memref<1x128xf32, #tpu.memory_space<vmem>>, vector<1x128xf32>
    %12 = vector.broadcast %11 : vector<1x128xf32> to vector<8x128xf32>
    %13 = arith.addf %10, %12 : vector<8x128xf32>
    %cst_11 = arith.constant 0.000000e+00 : f32
    %14 = vector.broadcast %cst_11 : f32 to vector<8x128xf32>
    %15 = arith.maximumf %13, %14 : vector<8x128xf32>
    %16 = arith.truncf %15 : vector<8x128xf32> to vector<8x128xbf16>
    %c0_12 = arith.constant 0 : index
    %c0_13 = arith.constant 0 : index
    %17 = vector.load %arg6[%c0_12, %c0_13] : memref<128x128xbf16, #tpu.memory_space<vmem>>, vector<128x128xbf16>
    %cst_14 = arith.constant dense<0.000000e+00> : vector<8x128xf32>
    %18 = tpu.matmul %16, %17, %cst_14 {dimension_numbers = #tpu.dot_dimension_numbers<[1], [0], [0], [1], [0, 0, 1, 1], [], []>} : vector<8x128xbf16>, vector<128x128xbf16>, vector<8x128xf32> -> vector<8x128xf32>
    %c0_15 = arith.constant 0 : index
    %c0_16 = arith.constant 0 : index
    %19 = vector.load %arg7[%c0_15, %c0_16] : memref<1x128xf32, #tpu.memory_space<vmem>>, vector<1x128xf32>
    %20 = vector.broadcast %19 : vector<1x128xf32> to vector<8x128xf32>
    %21 = arith.addf %18, %20 : vector<8x128xf32>
    %c0_17 = arith.constant 0 : index
    %c0_18 = arith.constant 0 : index
    %22 = vector.load %arg8[%c0_17, %c0_18] : memref<8x128xf32, #tpu.memory_space<vmem>>, vector<8x128xf32>
    tpu.vector_store %arg8[%c0_17, %c0_18], %21 {strides = array<i32>} : memref<8x128xf32, #tpu.memory_space<vmem>>, vector<8x128xf32>,
    return
  }
  func.func @transform_0(%arg0: i32) -> (i32, i32) {
    %c0_i32 = arith.constant 0 : i32
    %c0_i32_0 = arith.constant 0 : i32
    return %arg0, %c0_i32 : i32, i32
  }
  func.func @transform_1(%arg0: i32) -> (i32, i32) {
    %c0_i32 = arith.constant 0 : i32
    %c0_i32_0 = arith.constant 0 : i32
    %c0_i32_1 = arith.constant 0 : i32
    return %c0_i32, %c0_i32_0 : i32, i32
  }
  func.func @transform_2(%arg0: i32) -> (i32, i32) {
    %c0_i32 = arith.constant 0 : i32
    %c0_i32_0 = arith.constant 0 : i32
    %c0_i32_1 = arith.constant 0 : i32
    return %c0_i32, %c0_i32_0 : i32, i32
  }
  func.func @transform_3(%arg0: i32) -> (i32, i32) {
    %c0_i32 = arith.constant 0 : i32
    %c0_i32_0 = arith.constant 0 : i32
    %c0_i32_1 = arith.constant 0 : i32
    return %c0_i32, %c0_i32_0 : i32, i32
  }
  func.func @transform_4(%arg0: i32) -> (i32, i32) {
    %c0_i32 = arith.constant 0 : i32
    %c0_i32_0 = arith.constant 0 : i32
    %c0_i32_1 = arith.constant 0 : i32
    return %c0_i32, %c0_i32_0 : i32, i32
  }
  func.func @transform_5(%arg0: i32) -> (i32, i32) {
    %c0_i32 = arith.constant 0 : i32
    %c0_i32_0 = arith.constant 0 : i32
    %c0_i32_1 = arith.constant 0 : i32
    return %c0_i32, %c0_i32_0 : i32, i32
  }
  func.func @transform_6(%arg0: i32) -> (i32, i32) {
    %c0_i32 = arith.constant 0 : i32
    %c0_i32_0 = arith.constant 0 : i32
    %c0_i32_1 = arith.constant 0 : i32
    return %c0_i32, %c0_i32_0 : i32, i32
  }
  func.func @transform_7(%arg0: i32) -> (i32, i32) {
    %c0_i32 = arith.constant 0 : i32
    %c0_i32_0 = arith.constant 0 : i32
    return %arg0, %c0_i32 : i32, i32
  }
}

</mosaic_0001>

<bundles_post_ra>
// kernel: convnet_forward.3
= control target key start
LH: loop header
LB: loop body
LE: loop exit
PB: predicated region body
PF: predicated region fallthrough
CT: control target
= control target key end

     0   :  { %s2246_s21 = smov 0   ;;  %s2886_s0 = inlined_call_operand.vmem [shape: bf16[2,196,128], index: 0, kind: input, shape index: {}]   ;;  %s2887_s1 = inlined_call_operand.vmem [shape: bf16[2,196,128], index: 1, kind: input, shape index: {}]   ;;  %s2888_s2 = inlined_call_operand.vmem [shape: bf16[2,196,128], index: 2, kind: input, shape index: {}]   ;;  %s2889_s3 = inlined_call_operand.vmem [shape: bf16[2,196,128], index: 3, kind: input, shape index: {}]   ;;  %s2890_s4 = inlined_call_operand.vmem [shape: bf16[128,128], index: 4, kind: input, shape index: {}]   ;;  %s2891_s5 = inlined_call_operand.vmem [shape: f32[1,128], index: 5, kind: input, shape index: {}]   ;;  %s2892_s6 = inlined_call_operand.vmem [shape: bf16[2,196,6], index: 6, kind: output, shape index: {}]  }
   0x1 LB: > { %s1651_s22 = sadd.s32 4294967295, %s2207_s21   ;;  %p1655_p0 = scmp.ge.s32.totalorder %s2207_s21, 1  ;;  %s2207_s21 = sphi %s2246_s21, %s16_s21  }
   0x2   : > { %p242_p1 = scmp.lt.s32.totalorder %s2207_s21, 3 }
   0x4   : > { %p243_p2 = pnand %p1655_p0, %p242_p1 }
   0x6   : > { %246 = sbr.rel (%p243_p2) target bundleno = 469 (0x1d5), region = 44 }
   0xd   : > { %v2141_v0 = vld [vmem:[%s2890_s4] sm:$0xff]   ;;  %v2209_v1 = vmov 0.0   ;;  %v2142_v2 = vld [vmem:[%s2890_s4 + $0x8] sm:$0xff]   ;;  %p287_p3 = scmp.lt.s32.totalorder %s1651_s22, 1  ;;  %vm2210_vm0 = vmmov 0   ;;  %v2143_v3 = vld [vmem:[%s2890_s4 + $0x10] sm:$0xff]  }
   0xe   : > { %1858 = vmatprep.subr.bf16.mxu0 %v2209_v1  ;;  %1926 = vmatprep.subr.bf16.mxu1 %v2209_v1  ;;  %v2144_v4 = vld [vmem:[%s2890_s4 + $0x18] sm:$0xff]   ;;  %v2145_v5 = vld [vmem:[%s2890_s4 + $0x20] sm:$0xff]   ;;  %v2146_v6 = vld [vmem:[%s2890_s4 + $0x28] sm:$0xff]   ;;  %vm1533_vm1 = vcmask 44032   ;;  %vm1558_vm2 = vcmask 41984  }
   0xf   : > { %1859 = vmatpush3.bf16.msra.mxu0 %v2141_v0  ;;  %1927 = vmatpush3.bf16.msra.mxu1 %v2141_v0  ;;  %s2931_s22 = smov (!%p287_p3, %s1651_s22), 1  ;;  %v2147_v7 = vld [vmem:[%s2890_s4 + $0x30] sm:$0xff]   ;;  %v2310_v8 = vld [vmem:[%s2890_s4 + $0x38] sm:$0xff]   ;;  %v2501_v61 = vld [vmem:[%s2891_s5] ss:$0 sm:$0xff] }
  0x10   : > { %1860 = vmatprep.subr.bf16.mxu0 %v2209_v1  ;;  %1928 = vmatprep.subr.bf16.mxu1 %v2209_v1  ;;  %s2271_s29 = smul.u32 100, %s2931_s22 }
  0x11   : > { %1874 = vmatprep.mubr.msk.bf16.mxu0 %vm2210_vm0, %v2209_v1  ;;  %1942 = vmatprep.mubr.msk.bf16.mxu1 %vm2210_vm0, %v2209_v1 }
  0x12   : > { %s2279_s8 = scalar_lea.vmem %s2886_s0, %s2271_s29  ;;  %s2285_s11 = scalar_lea.vmem %s2887_s1, %s2271_s29 }
  0x13   : > { %1861 = vmatpush3.bf16.msra.mxu0 %v2142_v2  ;;  %1929 = vmatpush3.bf16.msra.mxu1 %v2142_v2  ;;  %v2149_v9 = vld [vmem:[%s2279_s8] sm:$0xff]   ;;  %s2324_s25 = scalar_lea.vmem %s2888_s2, %s2271_s29  ;;  %s2330_s28 = scalar_lea.vmem %s2889_s3, %s2271_s29  ;;  %v2151_v11 = vld [vmem:[%s2279_s8 + $0x8] sm:$0xff]   ;;  %v2153_v13 = vld [vmem:[%s2279_s8 + $0x10] sm:$0xff]  }
  0x14   : > { %1862 = vmatprep.subr.bf16.mxu0 %v2209_v1  ;;  %1930 = vmatprep.subr.bf16.mxu1 %v2209_v1  ;;  %v2150_v10 = vld [vmem:[%s2285_s11] sm:$0xff]   ;;  %v2152_v12 = vld [vmem:[%s2285_s11 + $0x8] sm:$0xff]   ;;  %v2154_v14 = vld [vmem:[%s2285_s11 + $0x10] sm:$0xff]   ;;  %s2717_s10 = scalar_lea.vmem %s2892_s6, %s2271_s29 }
  0x15   : > { %v2155_v15 = vld [vmem:[%s2279_s8 + $0x18] sm:$0xff]   ;;  %v2157_v17 = vld [vmem:[%s2279_s8 + $0x20] sm:$0xff]   ;;  %v2159_v19 = vld [vmem:[%s2279_s8 + $0x28] sm:$0xff]  }
  0x16   : > { %v2156_v16 = vld [vmem:[%s2285_s11 + $0x18] sm:$0xff]   ;;  %v2158_v18 = vld [vmem:[%s2285_s11 + $0x20] sm:$0xff]   ;;  %v2160_v20 = vld [vmem:[%s2285_s11 + $0x28] sm:$0xff]  }
  0x17   : > { %1863 = vmatpush3.bf16.msra.mxu0 %v2143_v3  ;;  %1931 = vmatpush3.bf16.msra.mxu1 %v2143_v3  ;;  %v2161_v21 = vld [vmem:[%s2279_s8 + $0x30] sm:$0xff]   ;;  %v2163_v23 = vld [vmem:[%s2279_s8 + $0x38] sm:$0xff]   ;;  %v2165_v25 = vld [vmem:[%s2279_s8 + $0x40] sm:$0xff]  }
  0x18   : > { %1864 = vmatprep.subr.bf16.mxu0 %v2209_v1  ;;  %1932 = vmatprep.subr.bf16.mxu1 %v2209_v1  ;;  %v2162_v22 = vld [vmem:[%s2285_s11 + $0x30] sm:$0xff]   ;;  %v2164_v24 = vld [vmem:[%s2285_s11 + $0x38] sm:$0xff]   ;;  %v2166_v26 = vld [vmem:[%s2285_s11 + $0x40] sm:$0xff]  }
  0x19   : > { %v2167_v27 = vld [vmem:[%s2279_s8 + $0x48] sm:$0xff]   ;;  %v2169_v29 = vld [vmem:[%s2279_s8 + $0x50] sm:$0xff]   ;;  %v2171_v31 = vld [vmem:[%s2279_s8 + $0x58] sm:$0xff]  }
  0x1a   : > { %v2168_v28 = vld [vmem:[%s2285_s11 + $0x48] sm:$0xff]   ;;  %v2170_v30 = vld [vmem:[%s2285_s11 + $0x50] sm:$0xff]   ;;  %v2172_v32 = vld [vmem:[%s2285_s11 + $0x58] sm:$0xff]  }
  0x1b   : > { %1865 = vmatpush3.bf16.msra.mxu0 %v2144_v4  ;;  %1933 = vmatpush3.bf16.msra.mxu1 %v2144_v4  ;;  %v2173_v33 = vld [vmem:[%s2279_s8 + $0x60] ss:$0 sps:$4 sm:$0x33]   ;;  %v2177_v37 = vld [vmem:[%s2324_s25 + $0x8] sm:$0xff]   ;;  %v2179_v39 = vld [vmem:[%s2324_s25 + $0x10] sm:$0xff]  }
  0x1c   : > { %1866 = vmatprep.subr.bf16.mxu0 %v2209_v1  ;;  %1934 = vmatprep.subr.bf16.mxu1 %v2209_v1  ;;  %v2174_v34 = vld [vmem:[%s2285_s11 + $0x60] ss:$0 sps:$4 sm:$0x33]   ;;  %v2178_v38 = vld [vmem:[%s2330_s28 + $0x8] sm:$0xff]   ;;  %v2180_v40 = vld [vmem:[%s2330_s28 + $0x10] sm:$0xff]  }
  0x1d   : > { %v2175_v35 = vld [vmem:[%s2324_s25] sm:$0xff]   ;;  %v2181_v41 = vld [vmem:[%s2324_s25 + $0x18] sm:$0xff]   ;;  %v2185_v45 = vld [vmem:[%s2324_s25 + $0x28] sm:$0xff]  }
  0x1e   : > { %v2176_v36 = vld [vmem:[%s2330_s28] sm:$0xff]   ;;  %v2182_v42 = vld [vmem:[%s2330_s28 + $0x18] sm:$0xff]   ;;  %v2186_v46 = vld [vmem:[%s2330_s28 + $0x28] sm:$0xff]  }
  0x1f   : > { %1867 = vmatpush3.bf16.msra.mxu0 %v2145_v5  ;;  %1935 = vmatpush3.bf16.msra.mxu1 %v2145_v5  ;;  %v2183_v43 = vld [vmem:[%s2324_s25 + $0x20] sm:$0xff]   ;;  %v2187_v47 = vld [vmem:[%s2324_s25 + $0x30] sm:$0xff]   ;;  %v2189_v49 = vld [vmem:[%s2324_s25 + $0x38] sm:$0xff]  }
  0x20   : > { %1868 = vmatprep.subr.bf16.mxu0 %v2209_v1  ;;  %1936 = vmatprep.subr.bf16.mxu1 %v2209_v1  ;;  %v2184_v44 = vld [vmem:[%s2330_s28 + $0x20] sm:$0xff]   ;;  %v2188_v48 = vld [vmem:[%s2330_s28 + $0x30] sm:$0xff]   ;;  %v2190_v50 = vld [vmem:[%s2330_s28 + $0x38] sm:$0xff]  }
  0x21   : > { %v2191_v51 = vld [vmem:[%s2324_s25 + $0x40] sm:$0xff]   ;;  %v2193_v53 = vld [vmem:[%s2324_s25 + $0x48] sm:$0xff]   ;;  %v2195_v55 = vld [vmem:[%s2324_s25 + $0x50] sm:$0xff]  }
  0x22   : > { %v2192_v52 = vld [vmem:[%s2330_s28 + $0x40] sm:$0xff]   ;;  %v2194_v54 = vld [vmem:[%s2330_s28 + $0x48] sm:$0xff]   ;;  %v2196_v56 = vld [vmem:[%s2330_s28 + $0x50] sm:$0xff]  }
  0x23   : > { %1869 = vmatpush3.bf16.msra.mxu0 %v2146_v6  ;;  %1937 = vmatpush3.bf16.msra.mxu1 %v2146_v6  ;;  %v2197_v57 = vld [vmem:[%s2324_s25 + $0x58] sm:$0xff]   ;;  %v2199_v59 = vld [vmem:[%s2324_s25 + $0x60] ss:$0 sps:$4 sm:$0x33]  }
  0x24   : > { %1870 = vmatprep.subr.bf16.mxu0 %v2209_v1  ;;  %1938 = vmatprep.subr.bf16.mxu1 %v2209_v1  ;;  %v2198_v58 = vld [vmem:[%s2330_s28 + $0x58] sm:$0xff]   ;;  %v2200_v60 = vld [vmem:[%s2330_s28 + $0x60] ss:$0 sps:$4 sm:$0x33]  }
  0x27   : > { %1871 = vmatpush3.bf16.msra.mxu0 %v2147_v7  ;;  %1939 = vmatpush3.bf16.msra.mxu1 %v2147_v7 }
  0x28   : > { %1872 = vmatprep.subr.bf16.mxu0 %v2209_v1  ;;  %1940 = vmatprep.subr.bf16.mxu1 %v2209_v1 }
  0x2b   : > { %1873 = vmatpush3.bf16.msra.mxu0 %v2310_v8  ;;  %1941 = vmatpush3.bf16.msra.mxu1 %v2310_v8 }
  0x2c   : > { %1994 = vmatprep.subr.bf16.mxu0 %v2209_v1  ;;  %2062 = vmatprep.subr.bf16.mxu1 %v2209_v1 }
  0x2e   : > { %1875 = vmatmul.mubr.bf16.vlgmr.msra.gmra.mrb[0].mxu0 %v2149_v9  ;;  %1943 = vmatmul.mubr.bf16.vlgmr.msra.gmra.mrb[0].mxu1 %v2150_v10 }
  0x2f   : > { %1995 = vmatpush3.bf16.msra.mxu0 %v2141_v0  ;;  %2063 = vmatpush3.bf16.msra.mxu1 %v2141_v0 }
  0x30   : > { %1878 = vmatprep.mubr.msk.bf16.mxu0 %vm2210_vm0, %v2209_v1  ;;  %1946 = vmatprep.mubr.msk.bf16.mxu1 %vm2210_vm0, %v2209_v1 }
  0x31   : > { %1996 = vmatprep.subr.bf16.mxu0 %v2209_v1  ;;  %2064 = vmatprep.subr.bf16.mxu1 %v2209_v1 }
  0x33   : > { %1997 = vmatpush3.bf16.msra.mxu0 %v2142_v2  ;;  %2065 = vmatpush3.bf16.msra.mxu1 %v2142_v2 }
  0x34   : > { %1998 = vmatprep.subr.bf16.mxu0 %v2209_v1  ;;  %2066 = vmatprep.subr.bf16.mxu1 %v2209_v1 }
  0x36   : > { %1879 = vmatmul.mubr.bf16.gmra.mrb[4].mxu0 %v2151_v11  ;;  %1947 = vmatmul.mubr.bf16.gmra.mrb[4].mxu1 %v2152_v12 }
  0x37   : > { %1882 = vmatprep.mubr.msk.bf16.mxu0 %vm2210_vm0, %v2209_v1  ;;  %1950 = vmatprep.mubr.msk.bf16.mxu1 %vm2210_vm0, %v2209_v1 }
  0x38   : > { %1999 = vmatpush3.bf16.msra.mxu0 %v2143_v3  ;;  %2067 = vmatpush3.bf16.msra.mxu1 %v2143_v3 }
  0x39   : > { %2000 = vmatprep.subr.bf16.mxu0 %v2209_v1  ;;  %2068 = vmatprep.subr.bf16.mxu1 %v2209_v1 }
  0x3c   : > { %2001 = vmatpush3.bf16.msra.mxu0 %v2144_v4  ;;  %2069 = vmatpush3.bf16.msra.mxu1 %v2144_v4 }
  0x3d   : > { %2002 = vmatprep.subr.bf16.mxu0 %v2209_v1  ;;  %2070 = vmatprep.subr.bf16.mxu1 %v2209_v1 }
  0x3e   : > { %1883 = vmatmul.mubr.bf16.gmra.mrb[8].mxu0 %v2153_v13  ;;  %1951 = vmatmul.mubr.bf16.gmra.mrb[8].mxu1 %v2154_v14 }
  0x3f   : > { %1886 = vmatprep.mubr.msk.bf16.mxu0 %vm2210_vm0, %v2209_v1  ;;  %1954 = vmatprep.mubr.msk.bf16.mxu1 %vm2210_vm0, %v2209_v1 }
  0x40   : > { %2003 = vmatpush3.bf16.msra.mxu0 %v2145_v5  ;;  %2071 = vmatpush3.bf16.msra.mxu1 %v2145_v5 }
  0x41   : > { %2004 = vmatprep.subr.bf16.mxu0 %v2209_v1  ;;  %2072 = vmatprep.subr.bf16.mxu1 %v2209_v1 }
  0x44   : > { %2005 = vmatpush3.bf16.msra.mxu0 %v2146_v6  ;;  %2073 = vmatpush3.bf16.msra.mxu1 %v2146_v6 }
  0x45   : > { %2006 = vmatprep.subr.bf16.mxu0 %v2209_v1  ;;  %2074 = vmatprep.subr.bf16.mxu1 %v2209_v1 }
  0x46   : > { %1887 = vmatmul.mubr.bf16.gmra.mrb[12].mxu0 %v2155_v15  ;;  %1955 = vmatmul.mubr.bf16.gmra.mrb[12].mxu1 %v2156_v16 }
  0x47   : > { %1890 = vmatprep.mubr.msk.bf16.mxu0 %vm2210_vm0, %v2209_v1  ;;  %1958 = vmatprep.mubr.msk.bf16.mxu1 %vm2210_vm0, %v2209_v1 }
  0x48   : > { %2007 = vmatpush3.bf16.msra.mxu0 %v2147_v7  ;;  %2075 = vmatpush3.bf16.msra.mxu1 %v2147_v7 }
  0x49   : > { %2008 = vmatprep.subr.bf16.mxu0 %v2209_v1  ;;  %2076 = vmatprep.subr.bf16.mxu1 %v2209_v1 }
  0x4c   : > { %2009 = vmatpush3.bf16.msra.mxu0 %v2310_v8  ;;  %2077 = vmatpush3.bf16.msra.mxu1 %v2310_v8 }
  0x4e   : > { %1891 = vmatmul.mubr.bf16.gmra.mrb[16].mxu0 %v2157_v17  ;;  %1959 = vmatmul.mubr.bf16.gmra.mrb[16].mxu1 %v2158_v18 }
  0x4f   : > { %1894 = vmatprep.mubr.msk.bf16.mxu0 %vm2210_vm0, %v2209_v1  ;;  %1962 = vmatprep.mubr.msk.bf16.mxu1 %vm2210_vm0, %v2209_v1 }
  0x56   : > { %1895 = vmatmul.mubr.bf16.gmra.mrb[20].mxu0 %v2159_v19  ;;  %1963 = vmatmul.mubr.bf16.gmra.mrb[20].mxu1 %v2160_v20 }
  0x57   : > { %1898 = vmatprep.mubr.msk.bf16.mxu0 %vm2210_vm0, %v2209_v1  ;;  %1966 = vmatprep.mubr.msk.bf16.mxu1 %vm2210_vm0, %v2209_v1 }
  0x5e   : > { %1899 = vmatmul.mubr.bf16.gmra.mrb[24].mxu0 %v2161_v21  ;;  %1967 = vmatmul.mubr.bf16.gmra.mrb[24].mxu1 %v2162_v22 }
  0x5f   : > { %1902 = vmatprep.mubr.msk.bf16.mxu0 %vm2210_vm0, %v2209_v1  ;;  %1970 = vmatprep.mubr.msk.bf16.mxu1 %vm2210_vm0, %v2209_v1 }
  0x66   : > { %1903 = vmatmul.mubr.bf16.gmra.mrb[28].mxu0 %v2163_v23  ;;  %1971 = vmatmul.mubr.bf16.gmra.mrb[28].mxu1 %v2164_v24 }
  0x67   : > { %1906 = vmatprep.mubr.msk.bf16.mxu0 %vm2210_vm0, %v2209_v1  ;;  %1974 = vmatprep.mubr.msk.bf16.mxu1 %vm2210_vm0, %v2209_v1 }
  0x6e   : > { %1907 = vmatmul.mubr.bf16.gmra.mrb[32].mxu0 %v2165_v25  ;;  %1975 = vmatmul.mubr.bf16.gmra.mrb[32].mxu1 %v2166_v26 }
  0x6f   : > { %1910 = vmatprep.mubr.msk.bf16.mxu0 %vm2210_vm0, %v2209_v1  ;;  %1978 = vmatprep.mubr.msk.bf16.mxu1 %vm2210_vm0, %v2209_v1 }
  0x76   : > { %1911 = vmatmul.mubr.bf16.gmra.mrb[36].mxu0 %v2167_v27  ;;  %1979 = vmatmul.mubr.bf16.gmra.mrb[36].mxu1 %v2168_v28 }
  0x77   : > { %1914 = vmatprep.mubr.msk.bf16.mxu0 %vm2210_vm0, %v2209_v1  ;;  %1982 = vmatprep.mubr.msk.bf16.mxu1 %vm2210_vm0, %v2209_v1 }
  0x7e   : > { %1915 = vmatmul.mubr.bf16.gmra.mrb[40].mxu0 %v2169_v29  ;;  %1983 = vmatmul.mubr.bf16.gmra.mrb[40].mxu1 %v2170_v30 }
  0x7f   : > { %1918 = vmatprep.mubr.msk.bf16.mxu0 %vm2210_vm0, %v2209_v1  ;;  %1986 = vmatprep.mubr.msk.bf16.mxu1 %vm2210_vm0, %v2209_v1 }
  0x86   : > { %1919 = vmatmul.mubr.bf16.gmra.mrb[44].mxu0 %v2171_v31  ;;  %1987 = vmatmul.mubr.bf16.gmra.mrb[44].mxu1 %v2172_v32 }
  0x87   : > { %1922 = vmatprep.mubr.msk.bf16.mxu0 %vm2210_vm0, %v2209_v1  ;;  %1990 = vmatprep.mubr.msk.bf16.mxu1 %vm2210_vm0, %v2209_v1 }
  0x8e   : > { %1923 = vmatmul.mubr.bf16.gmra.mrb[48].mxu0 %v2173_v33  ;;  %1991 = vmatmul.mubr.bf16.gmra.mrb[48].mxu1 %v2174_v34 }
  0x8f   : > { %2010 = vmatprep.mubr.msk.bf16.mxu0 %vm2210_vm0, %v2209_v1  ;;  %2078 = vmatprep.mubr.msk.bf16.mxu1 %vm2210_vm0, %v2209_v1 }
  0x96   : > { %2011 = vmatmul.mubr.bf16.vlgmr.msra.gmra.mrb[52].mxu0 %v2175_v35  ;;  %2079 = vmatmul.mubr.bf16.vlgmr.msra.gmra.mrb[52].mxu1 %v2176_v36 }
  0x97   : > { %2014 = vmatprep.mubr.msk.bf16.mxu0 %vm2210_vm0, %v2209_v1  ;;  %2082 = vmatprep.mubr.msk.bf16.mxu1 %vm2210_vm0, %v2209_v1 }
  0x9e   : > { %2015 = vmatmul.mubr.bf16.gmra.mrb[56].mxu0 %v2177_v37  ;;  %2083 = vmatmul.mubr.bf16.gmra.mrb[56].mxu1 %v2178_v38 }
  0x9f   : > { %2018 = vmatprep.mubr.msk.bf16.mxu0 %vm2210_vm0, %v2209_v1  ;;  %2086 = vmatprep.mubr.msk.bf16.mxu1 %vm2210_vm0, %v2209_v1 }
  0xa6   : > { %2019 = vmatmul.mubr.bf16.gmra.mrb[60].mxu0 %v2179_v39  ;;  %2087 = vmatmul.mubr.bf16.gmra.mrb[60].mxu1 %v2180_v40 }
  0xa7   : > { %2022 = vmatprep.mubr.msk.bf16.mxu0 %vm2210_vm0, %v2209_v1  ;;  %2090 = vmatprep.mubr.msk.bf16.mxu1 %vm2210_vm0, %v2209_v1 }
  0xae   : > { %2023 = vmatmul.mubr.bf16.gmra.mrb[64].mxu0 %v2181_v41  ;;  %2091 = vmatmul.mubr.bf16.gmra.mrb[64].mxu1 %v2182_v42 }
  0xaf   : > { %2026 = vmatprep.mubr.msk.bf16.mxu0 %vm2210_vm0, %v2209_v1  ;;  %2094 = vmatprep.mubr.msk.bf16.mxu1 %vm2210_vm0, %v2209_v1 }
  0xb6   : > { %2027 = vmatmul.mubr.bf16.gmra.mrb[68].mxu0 %v2183_v43  ;;  %2095 = vmatmul.mubr.bf16.gmra.mrb[68].mxu1 %v2184_v44 }
  0xb7   : > { %2030 = vmatprep.mubr.msk.bf16.mxu0 %vm2210_vm0, %v2209_v1  ;;  %2098 = vmatprep.mubr.msk.bf16.mxu1 %vm2210_vm0, %v2209_v1 }
  0xbe   : > { %2031 = vmatmul.mubr.bf16.gmra.mrb[72].mxu0 %v2185_v45  ;;  %2099 = vmatmul.mubr.bf16.gmra.mrb[72].mxu1 %v2186_v46 }
  0xbf   : > { %2034 = vmatprep.mubr.msk.bf16.mxu0 %vm2210_vm0, %v2209_v1  ;;  %2102 = vmatprep.mubr.msk.bf16.mxu1 %vm2210_vm0, %v2209_v1 }
  0xc6   : > { %2035 = vmatmul.mubr.bf16.gmra.mrb[76].mxu0 %v2187_v47  ;;  %2103 = vmatmul.mubr.bf16.gmra.mrb[76].mxu1 %v2188_v48 }
  0xc7   : > { %2038 = vmatprep.mubr.msk.bf16.mxu0 %vm2210_vm0, %v2209_v1  ;;  %2106 = vmatprep.mubr.msk.bf16.mxu1 %vm2210_vm0, %v2209_v1 }
  0xce   : > { %2039 = vmatmul.mubr.bf16.gmra.mrb[80].mxu0 %v2189_v49  ;;  %2107 = vmatmul.mubr.bf16.gmra.mrb[80].mxu1 %v2190_v50 }
  0xcf   : > { %2042 = vmatprep.mubr.msk.bf16.mxu0 %vm2210_vm0, %v2209_v1  ;;  %2110 = vmatprep.mubr.msk.bf16.mxu1 %vm2210_vm0, %v2209_v1 }
  0xd6   : > { %2043 = vmatmul.mubr.bf16.gmra.mrb[84].mxu0 %v2191_v51  ;;  %2111 = vmatmul.mubr.bf16.gmra.mrb[84].mxu1 %v2192_v52 }
  0xd7   : > { %2046 = vmatprep.mubr.msk.bf16.mxu0 %vm2210_vm0, %v2209_v1  ;;  %2114 = vmatprep.mubr.msk.bf16.mxu1 %vm2210_vm0, %v2209_v1 }
  0xde   : > { %2047 = vmatmul.mubr.bf16.gmra.mrb[88].mxu0 %v2193_v53  ;;  %2115 = vmatmul.mubr.bf16.gmra.mrb[88].mxu1 %v2194_v54 }
  0xdf   : > { %2050 = vmatprep.mubr.msk.bf16.mxu0 %vm2210_vm0, %v2209_v1  ;;  %2118 = vmatprep.mubr.msk.bf16.mxu1 %vm2210_vm0, %v2209_v1 }
  0xe6   : > { %2051 = vmatmul.mubr.bf16.gmra.mrb[92].mxu0 %v2195_v55  ;;  %2119 = vmatmul.mubr.bf16.gmra.mrb[92].mxu1 %v2196_v56 }
  0xe7   : > { %2054 = vmatprep.mubr.msk.bf16.mxu0 %vm2210_vm0, %v2209_v1  ;;  %2122 = vmatprep.mubr.msk.bf16.mxu1 %vm2210_vm0, %v2209_v1 }
  0xee   : > { %2055 = vmatmul.mubr.bf16.gmra.mrb[96].mxu0 %v2197_v57  ;;  %2123 = vmatmul.mubr.bf16.gmra.mrb[96].mxu1 %v2198_v58 }
  0xef   : > { %2058 = vmatprep.mubr.msk.bf16.mxu0 %vm2210_vm0, %v2209_v1  ;;  %2126 = vmatprep.mubr.msk.bf16.mxu1 %vm2210_vm0, %v2209_v1 }
  0xf6   : > { %2059 = vmatmul.mubr.bf16.gmra.mrb[100].mxu0 %v2199_v59  ;;  %2127 = vmatmul.mubr.bf16.gmra.mrb[100].mxu1 %v2200_v60 }
 0x101   : > { %v519_v62 = vpop.f32.mrb[0].mxu0  ;;  %v756_v63 = vpop.f32.mrb[0].mxu1 }
 0x102   : > { %v2504_v0 = vadd.f32 %v2501_v61, %v519_v62  ;;  %v2507_v2 = vadd.f32 %v2501_v61, %v756_v63  ;;  %v1876_v3 = vpop.f32.mrb[1].mxu0  ;;  %v1944_v4 = vpop.f32.mrb[1].mxu1 }
 0x103   : > { %v522_v1 = vpop.f32.mrb[2].mxu0  ;;  %v759_v5 = vpop.f32.mrb[2].mxu1 }
 0x104   : > { %v2512_v7 = vadd.f32 %v2501_v61, %v522_v1  ;;  %v2515_v8 = vadd.f32 %v2501_v61, %v759_v5  ;;  %v1877_v9 = vpop.f32.mrb[3].mxu0  ;;  %v1945_v10 = vpop.f32.mrb[3].mxu1 }
 0x109   : > { %v527_v12 = vpop.f32.mrb[4].mxu0  ;;  %v764_v13 = vpop.f32.mrb[4].mxu1 }
 0x10a   : > { %v2520_v14 = vadd.f32 %v2501_v61, %v527_v12  ;;  %v2523_v15 = vadd.f32 %v2501_v61, %v764_v13  ;;  %v1880_v16 = vpop.f32.mrb[5].mxu0  ;;  %v1948_v17 = vpop.f32.mrb[5].mxu1 }
 0x10b   : > { %v530_v18 = vpop.f32.mrb[6].mxu0  ;;  %v767_v19 = vpop.f32.mrb[6].mxu1 }
 0x10c   : > { %v2528_v21 = vadd.f32 %v2501_v61, %v530_v18  ;;  %v2531_v22 = vadd.f32 %v2501_v61, %v767_v19  ;;  %v1881_v23 = vpop.f32.mrb[7].mxu0  ;;  %v1949_v24 = vpop.f32.mrb[7].mxu1 }
 0x111   : > { %v535_v26 = vpop.f32.mrb[8].mxu0  ;;  %v772_v27 = vpop.f32.mrb[8].mxu1 }
 0x112   : > { %v2536_v28 = vadd.f32 %v2501_v61, %v535_v26  ;;  %v2539_v29 = vadd.f32 %v2501_v61, %v772_v27  ;;  %v1884_v30 = vpop.f32.mrb[9].mxu0  ;;  %v1952_v31 = vpop.f32.mrb[9].mxu1 }
 0x113   : > { %v538_v32 = vpop.f32.mrb[10].mxu0  ;;  %v775_v33 = vpop.f32.mrb[10].mxu1 }
 0x114   : > { %v2544_v35 = vadd.f32 %v2501_v61, %v538_v32  ;;  %v2547_v36 = vadd.f32 %v2501_v61, %v775_v33  ;;  %v1885_v37 = vpop.f32.mrb[11].mxu0  ;;  %v1953_v38 = vpop.f32.mrb[11].mxu1 }
 0x119   : > { %v543_v40 = vpop.f32.mrb[12].mxu0  ;;  %v780_v41 = vpop.f32.mrb[12].mxu1 }
 0x11a   : > { %v2552_v42 = vadd.f32 %v2501_v61, %v543_v40  ;;  %v2555_v43 = vadd.f32 %v2501_v61, %v780_v41  ;;  %v1888_v44 = vpop.f32.mrb[13].mxu0  ;;  %v1956_v45 = vpop.f32.mrb[13].mxu1 }
 0x11b   : > { %v546_v46 = vpop.f32.mrb[14].mxu0  ;;  %v783_v47 = vpop.f32.mrb[14].mxu1 }
 0x11c   : > { %v2560_v49 = vadd.f32 %v2501_v61, %v546_v46  ;;  %v2563_v50 = vadd.f32 %v2501_v61, %v783_v47  ;;  %v1889_v51 = vpop.f32.mrb[15].mxu0  ;;  %v1957_v52 = vpop.f32.mrb[15].mxu1 }
 0x121   : > { %v551_v54 = vpop.f32.mrb[16].mxu0  ;;  %v788_v55 = vpop.f32.mrb[16].mxu1 }
 0x122   : > { %v2568_v56 = vadd.f32 %v2501_v61, %v551_v54  ;;  %v2571_v57 = vadd.f32 %v2501_v61, %v788_v55  ;;  %v1892_v58 = vpop.f32.mrb[17].mxu0  ;;  %v1960_v59 = vpop.f32.mrb[17].mxu1 }
 0x123   : > { %v554_v60 = vpop.f32.mrb[18].mxu0  ;;  %v791_v62 = vpop.f32.mrb[18].mxu1 }
 0x124   : > { %v2576_v3 = vadd.f32 %v2501_v61, %v554_v60  ;;  %v2579_v4 = vadd.f32 %v2501_v61, %v791_v62  ;;  %v1893_v1 = vpop.f32.mrb[19].mxu0  ;;  %v1961_v5 = vpop.f32.mrb[19].mxu1 }
 0x129   : > { %v559_v10 = vpop.f32.mrb[20].mxu0  ;;  %v796_v12 = vpop.f32.mrb[20].mxu1 }
 0x12a   : > { %v2584_v13 = vadd.f32 %v2501_v61, %v559_v10  ;;  %v2587_v16 = vadd.f32 %v2501_v61, %v796_v12  ;;  %v1896_v17 = vpop.f32.mrb[21].mxu0  ;;  %v1964_v18 = vpop.f32.mrb[21].mxu1 }
 0x12b   : > { %v562_v19 = vpop.f32.mrb[22].mxu0  ;;  %v799_v23 = vpop.f32.mrb[22].mxu1 }
 0x12c   : > { %v2592_v26 = vadd.f32 %v2501_v61, %v562_v19  ;;  %v2595_v27 = vadd.f32 %v2501_v61, %v799_v23  ;;  %v1897_v30 = vpop.f32.mrb[23].mxu0  ;;  %v1965_v31 = vpop.f32.mrb[23].mxu1 }
 0x131   : > { %v567_v33 = vpop.f32.mrb[24].mxu0  ;;  %v804_v37 = vpop.f32.mrb[24].mxu1 }
 0x132   : > { %v2600_v38 = vadd.f32 %v2501_v61, %v567_v33  ;;  %v2603_v40 = vadd.f32 %v2501_v61, %v804_v37  ;;  %v1900_v41 = vpop.f32.mrb[25].mxu0  ;;  %v1968_v44 = vpop.f32.mrb[25].mxu1 }
 0x133   : > { %v570_v45 = vpop.f32.mrb[26].mxu0  ;;  %v807_v46 = vpop.f32.mrb[26].mxu1 }
 0x134   : > { %v2608_v51 = vadd.f32 %v2501_v61, %v570_v45  ;;  %v2611_v52 = vadd.f32 %v2501_v61, %v807_v46  ;;  %v1901_v54 = vpop.f32.mrb[27].mxu0  ;;  %v1969_v55 = vpop.f32.mrb[27].mxu1 }
 0x139   : > { %v575_v59 = vpop.f32.mrb[28].mxu0  ;;  %v812_v60 = vpop.f32.mrb[28].mxu1 }
 0x13a   : > { %v2616_v62 = vadd.f32 %v2501_v61, %v575_v59  ;;  %v2619_v1 = vadd.f32 %v2501_v61, %v812_v60  ;;  %v1904_v5 = vpop.f32.mrb[29].mxu0  ;;  %v1972_v10 = vpop.f32.mrb[29].mxu1 }
 0x13b   : > { %v578_v12 = vpop.f32.mrb[30].mxu0  ;;  %v815_v17 = vpop.f32.mrb[30].mxu1 }
 0x13c   : > { %v2624_v19 = vadd.f32 %v2501_v61, %v578_v12  ;;  %v2627_v23 = vadd.f32 %v2501_v61, %v815_v17  ;;  %v1905_v30 = vpop.f32.mrb[31].mxu0  ;;  %v1973_v31 = vpop.f32.mrb[31].mxu1 }
 0x141   : > { %v583_v37 = vpop.f32.mrb[32].mxu0  ;;  %v820_v41 = vpop.f32.mrb[32].mxu1 }
 0x142   : > { %v2632_v44 = vadd.f32 %v2501_v61, %v583_v37  ;;  %v2635_v45 = vadd.f32 %v2501_v61, %v820_v41  ;;  %v1908_v46 = vpop.f32.mrb[33].mxu0  ;;  %v1976_v54 = vpop.f32.mrb[33].mxu1 }
 0x143   : > { %v586_v55 = vpop.f32.mrb[34].mxu0  ;;  %v823_v59 = vpop.f32.mrb[34].mxu1 }
 0x144   : > { %v2640_v5 = vadd.f32 %v2501_v61, %v586_v55  ;;  %v2643_v10 = vadd.f32 %v2501_v61, %v823_v59  ;;  %v1909_v12 = vpop.f32.mrb[35].mxu0  ;;  %v1977_v17 = vpop.f32.mrb[35].mxu1 }
 0x149   : > { %v591_v31 = vpop.f32.mrb[36].mxu0  ;;  %v828_v37 = vpop.f32.mrb[36].mxu1 }
 0x14a   : > { %v2648_v41 = vadd.f32 %v2501_v61, %v591_v31  ;;  %v2651_v46 = vadd.f32 %v2501_v61, %v828_v37  ;;  %v1912_v54 = vpop.f32.mrb[37].mxu0  ;;  %v1980_v60 = vpop.f32.mrb[37].mxu1 }
 0x14b   : > { %v594_v55 = vpop.f32.mrb[38].mxu0  ;;  %v831_v33 = vpop.f32.mrb[38].mxu1 }
 0x14c   : > { %v2656_v12 = vadd.f32 %v2501_v61, %v594_v55  ;;  %v2659_v17 = vadd.f32 %v2501_v61, %v831_v33  ;;  %v1913_v30 = vpop.f32.mrb[39].mxu0  ;;  %v1981_v18 = vpop.f32.mrb[39].mxu1 }
 0x151   : > { %v599_v37 = vpop.f32.mrb[40].mxu0  ;;  %v836_v58 = vpop.f32.mrb[40].mxu1 }
 0x152   : > { %v2664_v60 = vadd.f32 %v2501_v61, %v599_v37  ;;  %v2667_v54 = vadd.f32 %v2501_v61, %v836_v58  ;;  %v1916_v59 = vpop.f32.mrb[41].mxu0  ;;  %v1984_v47 = vpop.f32.mrb[41].mxu1 }
 0x153   : > { %v602_v55 = vpop.f32.mrb[42].mxu0  ;;  %v839_v32 = vpop.f32.mrb[42].mxu1 }
 0x154   : > { %v2672_v18 = vadd.f32 %v2501_v61, %v602_v55  ;;  %v2675_v30 = vadd.f32 %v2501_v61, %v839_v32  ;;  %v1917_v31 = vpop.f32.mrb[43].mxu0  ;;  %v1985_v24 = vpop.f32.mrb[43].mxu1 }
 0x159   : > { %v607_v58 = vpop.f32.mrb[44].mxu0  ;;  %v844_v9 = vpop.f32.mrb[44].mxu1 }
 0x15a   : > { %v2680_v47 = vadd.f32 %v2501_v61, %v607_v58  ;;  %v2683_v59 = vadd.f32 %v2501_v61, %v844_v9  ;;  %v1920_v33 = vpop.f32.mrb[45].mxu0  ;;  %v1988_v63 = vpop.f32.mrb[45].mxu1 }
 0x15b   : > { %v610_v55 = vpop.f32.mrb[46].mxu0  ;;  %v847_v53 = vpop.f32.mrb[46].mxu1 }
 0x15c   : > { %v2688_v24 = vadd.f32 %v2501_v61, %v610_v55  ;;  %v2691_v31 = vadd.f32 %v2501_v61, %v847_v53  ;;  %v1921_v37 = vpop.f32.mrb[47].mxu0  ;;  %v1989_v48 = vpop.f32.mrb[47].mxu1 }
 0x15e   : > { %2897 = vst [vmem:[#allocation2_spill] sm:$0xff] %v2688_v24  ;;  %2898 = vst [vmem:[#allocation3_spill] sm:$0xff] %v2691_v31 }
 0x161   : > { %v615_v9 = vpop.f32.mrb[48].mxu0  ;;  %v852_v39 = vpop.f32.mrb[48].mxu1 }
 0x162   : > { %v2696_v63 = vadd.f32 %v2501_v61, %v615_v9  ;;  %v2699_v33 = vadd.f32 %v2501_v61, %v852_v39  ;;  %v1924_v32 = vpop.f32.mrb[49].mxu0  ;;  %v1992_v34 = vpop.f32.mrb[49].mxu1 }
 0x163   : > { %v618_v55 = vpop.f32.mrb[50].mxu0  ;;  %v855_v25 = vpop.f32.mrb[50].mxu1 }
 0x164   : > { %2899 = vst [vmem:[#allocation4_spill] sm:$0xff] %v2696_v63  ;;  %2900 = vst [vmem:[#allocation5_spill] sm:$0xff] %v2699_v33  ;;  %v1925_v37 = vpop.f32.mrb[51].mxu0  ;;  %v1993_v48 = vpop.f32.mrb[51].mxu1 }
 0x165   : > { %v2901_v37 = vmax.f32 %v2504_v0, %v2507_v2 }
 0x169   : > { %v1018_v20 = vpop.f32.mrb[52].mxu0  ;;  %v1255_v11 = vpop.f32.mrb[52].mxu1 }
 0x16a   : > { %v1019_v58 = vadd.f32 %v2501_v61, %v1018_v20  ;;  %v1256_v9 = vadd.f32 %v2501_v61, %v1255_v11  ;;  %v2012_v6 = vpop.f32.mrb[53].mxu0  ;;  %v2080_v31 = vpop.f32.mrb[53].mxu1  ;;  %v2902_v11 = vmax.f32 %v2512_v7, %v2515_v8 }
 0x16b   : > { %v1021_v39 = vpop.f32.mrb[54].mxu0  ;;  %v1258_v24 = vpop.f32.mrb[54].mxu1 }
 0x16c   : > { %v1357_v32 = vmax.f32 %v1019_v58, %v1256_v9  ;;  %v1022_v34 = vadd.f32 %v2501_v61, %v1021_v39  ;;  %v1259_v25 = vadd.f32 %v2501_v61, %v1258_v24  ;;  %v2013_v55 = vpop.f32.mrb[55].mxu0  ;;  %v2081_v53 = vpop.f32.mrb[55].mxu1 }
 0x16e   : > { %v1382_v48 = vmax.f32 %v2901_v37, %v1357_v32  ;;  %v1358_v33 = vmax.f32 %v1022_v34, %v1259_v25 }
 0x170   : > { %v1407_v63 = vmax.f32 %v1382_v48, 0.0  ;;  %v1383_v6 = vmax.f32 %v2902_v11, %v1358_v33 }
 0x171   : > { %v1026_v20 = vpop.f32.mrb[56].mxu0  ;;  %v1263_v24 = vpop.f32.mrb[56].mxu1 }
 0x172   : > { %v1749_v31 = vpack.c.bf16 %v1407_v63, %v1407_v63  ;;  %v1408_v58 = vmax.f32 %v1383_v6, 0.0  ;;  %v1027_v0 = vadd.f32 %v2501_v61, %v1026_v20  ;;  %v1264_v2 = vadd.f32 %v2501_v61, %v1263_v24  ;;  %v2016_v53 = vpop.f32.mrb[57].mxu0  ;;  %v2084_v9 = vpop.f32.mrb[57].mxu1 }
 0x173   : > { %v1029_v7 = vpop.f32.mrb[58].mxu0  ;;  %v1266_v8 = vpop.f32.mrb[58].mxu1  ;;  %v2903_v63 = vmax.f32 %v2520_v14, %v2523_v15  ;;  %v2904_v6 = vmax.f32 %v2528_v21, %v2531_v22 }
 0x174   : > { %1534 = vst.msk [vmem:[%s2717_s10] sm:$0xf] %vm1533_vm1, %v1749_v31  ;;  %v1750_v33 = vpack.c.bf16 %v1408_v58, %v1408_v58  ;;  %v1359_v39 = vmax.f32 %v1027_v0, %v1264_v2  ;;  %v1030_v32 = vadd.f32 %v2501_v61, %v1029_v7  ;;  %v1267_v34 = vadd.f32 %v2501_v61, %v1266_v8  ;;  %v2017_v25 = vpop.f32.mrb[59].mxu0  ;;  %v2085_v55 = vpop.f32.mrb[59].mxu1 }
 0x176   : > { %1535 = vst.msk [vmem:[%s2717_s10 + $0x4] sm:$0xf] %vm1533_vm1, %v1750_v33  ;;  %v1384_v37 = vmax.f32 %v2903_v63, %v1359_v39  ;;  %v1360_v48 = vmax.f32 %v1030_v32, %v1267_v34  ;;  %v2905_v34 = vmax.f32 %v2536_v28, %v2539_v29 }
 0x178   : > { %v1409_v11 = vmax.f32 %v1384_v37, 0.0  ;;  %v1385_v20 = vmax.f32 %v2904_v6, %v1360_v48  ;;  %v2906_v37 = vmax.f32 %v2544_v35, %v2547_v36 }
 0x179   : > { %v1034_v24 = vpop.f32.mrb[60].mxu0  ;;  %v1271_v31 = vpop.f32.mrb[60].mxu1 }
 0x17a   : > { %v1751_v58 = vpack.c.bf16 %v1409_v11, %v1409_v11  ;;  %v1410_v0 = vmax.f32 %v1385_v20, 0.0  ;;  %v1035_v2 = vadd.f32 %v2501_v61, %v1034_v24  ;;  %v1272_v53 = vadd.f32 %v2501_v61, %v1271_v31  ;;  %v2020_v9 = vpop.f32.mrb[61].mxu0  ;;  %v2088_v7 = vpop.f32.mrb[61].mxu1 }
 0x17b   : > { %v1037_v8 = vpop.f32.mrb[62].mxu0  ;;  %v1274_v14 = vpop.f32.mrb[62].mxu1 }
 0x17c   : > { %1536 = vst.msk [vmem:[%s2717_s10 + $0x8] sm:$0xf] %vm1533_vm1, %v1751_v58  ;;  %v1752_v15 = vpack.c.bf16 %v1410_v0, %v1410_v0  ;;  %v1361_v33 = vmax.f32 %v1035_v2, %v1272_v53  ;;  %v1038_v21 = vadd.f32 %v2501_v61, %v1037_v8  ;;  %v1275_v22 = vadd.f32 %v2501_v61, %v1274_v14  ;;  %v2021_v39 = vpop.f32.mrb[63].mxu0  ;;  %v2089_v32 = vpop.f32.mrb[63].mxu1 }
 0x17d   : > { %v2907_v14 = vmax.f32 %v2552_v42, %v2555_v43 }
 0x17e   : > { %1537 = vst.msk [vmem:[%s2717_s10 + $0xc] sm:$0xf] %vm1533_vm1, %v1752_v15  ;;  %v1386_v25 = vmax.f32 %v2905_v34, %v1361_v33  ;;  %v1362_v55 = vmax.f32 %v1038_v21, %v1275_v22  ;;  %v2908_v22 = vmax.f32 %v2560_v49, %v2563_v50 }
 0x180   : > { %v1411_v63 = vmax.f32 %v1386_v25, 0.0  ;;  %v1387_v48 = vmax.f32 %v2906_v37, %v1362_v55 }
 0x181   : > { %v1042_v11 = vpop.f32.mrb[64].mxu0  ;;  %v1279_v6 = vpop.f32.mrb[64].mxu1 }
 0x182   : > { %v1753_v20 = vpack.c.bf16 %v1411_v63, %v1411_v63  ;;  %v1412_v24 = vmax.f32 %v1387_v48, 0.0  ;;  %v1043_v31 = vadd.f32 %v2501_v61, %v1042_v11  ;;  %v1280_v58 = vadd.f32 %v2501_v61, %v1279_v6  ;;  %v2024_v0 = vpop.f32.mrb[65].mxu0  ;;  %v2092_v2 = vpop.f32.mrb[65].mxu1 }
 0x183   : > { %v1045_v53 = vpop.f32.mrb[66].mxu0  ;;  %v1282_v28 = vpop.f32.mrb[66].mxu1 }
 0x184   : > { %1538 = vst.msk [vmem:[%s2717_s10 + $0x10] sm:$0xf] %vm1533_vm1, %v1753_v20  ;;  %v1754_v29 = vpack.c.bf16 %v1412_v24, %v1412_v24  ;;  %v1363_v9 = vmax.f32 %v1043_v31, %v1280_v58  ;;  %v1046_v35 = vadd.f32 %v2501_v61, %v1045_v53  ;;  %v1283_v36 = vadd.f32 %v2501_v61, %v1282_v28  ;;  %v2025_v7 = vpop.f32.mrb[67].mxu0  ;;  %v2093_v8 = vpop.f32.mrb[67].mxu1 }
 0x185   : > { %v2909_v58 = vmax.f32 %v2568_v56, %v2571_v57  ;;  %v2910_v28 = vmax.f32 %v2576_v3, %v2579_v4 }
 0x186   : > { %1539 = vst.msk [vmem:[%s2717_s10 + $0x14] sm:$0xf] %vm1533_vm1, %v1754_v29  ;;  %v1388_v15 = vmax.f32 %v2907_v14, %v1363_v9  ;;  %v1364_v33 = vmax.f32 %v1046_v35, %v1283_v36 }
 0x188   : > { %v1413_v21 = vmax.f32 %v1388_v15, 0.0  ;;  %v1389_v39 = vmax.f32 %v2908_v22, %v1364_v33 }
 0x189   : > { %v1050_v32 = vpop.f32.mrb[68].mxu0  ;;  %v1287_v34 = vpop.f32.mrb[68].mxu1 }
 0x18a   : > { %v1755_v25 = vpack.c.bf16 %v1413_v21, %v1413_v21  ;;  %v1414_v55 = vmax.f32 %v1389_v39, 0.0  ;;  %v1051_v63 = vadd.f32 %v2501_v61, %v1050_v32  ;;  %v1288_v37 = vadd.f32 %v2501_v61, %v1287_v34  ;;  %v2028_v48 = vpop.f32.mrb[69].mxu0  ;;  %v2096_v11 = vpop.f32.mrb[69].mxu1 }
 0x18b   : > { %v1053_v6 = vpop.f32.mrb[70].mxu0  ;;  %v1290_v42 = vpop.f32.mrb[70].mxu1  ;;  %v2911_v34 = vmax.f32 %v2584_v13, %v2587_v16 }
 0x18c   : > { %1540 = vst.msk [vmem:[%s2717_s10 + $0x18] sm:$0xf] %vm1533_vm1, %v1755_v25  ;;  %v1756_v43 = vpack.c.bf16 %v1414_v55, %v1414_v55  ;;  %v1365_v20 = vmax.f32 %v1051_v63, %v1288_v37  ;;  %v1054_v49 = vadd.f32 %v2501_v61, %v1053_v6  ;;  %v1291_v50 = vadd.f32 %v2501_v61, %v1290_v42  ;;  %v2029_v24 = vpop.f32.mrb[71].mxu0  ;;  %v2097_v31 = vpop.f32.mrb[71].mxu1 }
 0x18d   : > { %v2912_v37 = vmax.f32 %v2592_v26, %v2595_v27 }
 0x18e   : > { %1541 = vst.msk [vmem:[%s2717_s10 + $0x1c] sm:$0xf] %vm1533_vm1, %v1756_v43  ;;  %v1390_v0 = vmax.f32 %v2909_v58, %v1365_v20  ;;  %v1366_v2 = vmax.f32 %v1054_v49, %v1291_v50 }
 0x190   : > { %v1415_v53 = vmax.f32 %v1390_v0, 0.0  ;;  %v1391_v29 = vmax.f32 %v2910_v28, %v1366_v2 }
 0x191   : > { %v1058_v9 = vpop.f32.mrb[72].mxu0  ;;  %v1295_v35 = vpop.f32.mrb[72].mxu1 }
 0x192   : > { %v1757_v36 = vpack.c.bf16 %v1415_v53, %v1415_v53  ;;  %v1416_v7 = vmax.f32 %v1391_v29, 0.0  ;;  %v1059_v8 = vadd.f32 %v2501_v61, %v1058_v9  ;;  %v1296_v14 = vadd.f32 %v2501_v61, %v1295_v35  ;;  %v2032_v15 = vpop.f32.mrb[73].mxu0  ;;  %v2100_v33 = vpop.f32.mrb[73].mxu1 }
 0x193   : > { %v1061_v21 = vpop.f32.mrb[74].mxu0  ;;  %v1298_v56 = vpop.f32.mrb[74].mxu1  ;;  %v2913_v53 = vmax.f32 %v2600_v38, %v2603_v40  ;;  %v2914_v35 = vmax.f32 %v2608_v51, %v2611_v52 }
 0x194   : > { %1542 = vst.msk [vmem:[%s2717_s10 + $0x20] sm:$0xf] %vm1533_vm1, %v1757_v36  ;;  %v1758_v57 = vpack.c.bf16 %v1416_v7, %v1416_v7  ;;  %v1367_v22 = vmax.f32 %v1059_v8, %v1296_v14  ;;  %v1062_v3 = vadd.f32 %v2501_v61, %v1061_v21  ;;  %v1299_v4 = vadd.f32 %v2501_v61, %v1298_v56  ;;  %v2033_v39 = vpop.f32.mrb[75].mxu0  ;;  %v2101_v32 = vpop.f32.mrb[75].mxu1 }
 0x195   : > { %v2915_v32 = vmax.f32 %v2616_v62, %v2619_v1 }
 0x196   : > { %1543 = vst.msk [vmem:[%s2717_s10 + $0x24] sm:$0xf] %vm1533_vm1, %v1758_v57  ;;  %v1392_v25 = vmax.f32 %v2911_v34, %v1367_v22  ;;  %v1368_v55 = vmax.f32 %v1062_v3, %v1299_v4 }
 0x198   : > { %v1417_v63 = vmax.f32 %v1392_v25, 0.0  ;;  %v1393_v48 = vmax.f32 %v2912_v37, %v1368_v55 }
 0x199   : > { %v1066_v11 = vpop.f32.mrb[76].mxu0  ;;  %v1303_v6 = vpop.f32.mrb[76].mxu1 }
 0x19a   : > { %v1759_v42 = vpack.c.bf16 %v1417_v63, %v1417_v63  ;;  %v1418_v43 = vmax.f32 %v1393_v48, 0.0  ;;  %v1067_v20 = vadd.f32 %v2501_v61, %v1066_v11  ;;  %v1304_v49 = vadd.f32 %v2501_v61, %v1303_v6  ;;  %v2036_v50 = vpop.f32.mrb[77].mxu0  ;;  %v2104_v24 = vpop.f32.mrb[77].mxu1 }
 0x19b   : > { %v1069_v31 = vpop.f32.mrb[78].mxu0  ;;  %v1306_v13 = vpop.f32.mrb[78].mxu1  ;;  %v2916_v63 = vmax.f32 %v2624_v19, %v2627_v23 }
 0x19c   : > { %1544 = vst.msk [vmem:[%s2717_s10 + $0x28] sm:$0xf] %vm1533_vm1, %v1759_v42  ;;  %v1760_v16 = vpack.c.bf16 %v1418_v43, %v1418_v43  ;;  %v1369_v58 = vmax.f32 %v1067_v20, %v1304_v49  ;;  %v1070_v26 = vadd.f32 %v2501_v61, %v1069_v31  ;;  %v1307_v27 = vadd.f32 %v2501_v61, %v1306_v13  ;;  %v2037_v0 = vpop.f32.mrb[79].mxu0  ;;  %v2105_v2 = vpop.f32.mrb[79].mxu1 }
 0x19d   : > { %v2918_v2 = vmax.f32 %v2640_v5, %v2643_v10 }
 0x19e   : > { %1545 = vst.msk [vmem:[%s2717_s10 + $0x2c] sm:$0xf] %vm1533_vm1, %v1760_v16  ;;  %v1394_v28 = vmax.f32 %v2913_v53, %v1369_v58  ;;  %v1370_v29 = vmax.f32 %v1070_v26, %v1307_v27  ;;  %v2917_v58 = vmax.f32 %v2632_v44, %v2635_v45 }
 0x1a0   : > { %v1419_v9 = vmax.f32 %v1394_v28, 0.0  ;;  %v1395_v36 = vmax.f32 %v2914_v35, %v1370_v29 }
 0x1a1   : > { %v1074_v7 = vpop.f32.mrb[80].mxu0  ;;  %v1311_v8 = vpop.f32.mrb[80].mxu1 }
 0x1a2   : > { %v1761_v14 = vpack.c.bf16 %v1419_v9, %v1419_v9  ;;  %v1420_v15 = vmax.f32 %v1395_v36, 0.0  ;;  %v1075_v33 = vadd.f32 %v2501_v61, %v1074_v7  ;;  %v1312_v21 = vadd.f32 %v2501_v61, %v1311_v8  ;;  %v2040_v56 = vpop.f32.mrb[81].mxu0  ;;  %v2108_v57 = vpop.f32.mrb[81].mxu1 }
 0x1a3   : > { %v1077_v22 = vpop.f32.mrb[82].mxu0  ;;  %v1314_v38 = vpop.f32.mrb[82].mxu1  ;;  %v2919_v57 = vmax.f32 %v2648_v41, %v2651_v46 }
 0x1a4   : > { %1546 = vst.msk [vmem:[%s2717_s10 + $0x30] sm:$0xf] %vm1533_vm1, %v1761_v14  ;;  %v1762_v40 = vpack.c.bf16 %v1420_v15, %v1420_v15  ;;  %v1371_v3 = vmax.f32 %v1075_v33, %v1312_v21  ;;  %v1078_v51 = vadd.f32 %v2501_v61, %v1077_v22  ;;  %v1315_v52 = vadd.f32 %v2501_v61, %v1314_v38  ;;  %v2041_v4 = vpop.f32.mrb[83].mxu0  ;;  %v2109_v39 = vpop.f32.mrb[83].mxu1 }
 0x1a6   : > { %1547 = vst.msk [vmem:[%s2717_s10 + $0x34] sm:$0xf] %vm1533_vm1, %v1762_v40  ;;  %v1396_v34 = vmax.f32 %v2915_v32, %v1371_v3  ;;  %v1372_v25 = vmax.f32 %v1078_v51, %v1315_v52  ;;  %v2920_v3 = vmax.f32 %v2656_v12, %v2659_v17 }
 0x1a8   : > { %v1421_v55 = vmax.f32 %v1396_v34, 0.0  ;;  %v1397_v37 = vmax.f32 %v2916_v63, %v1372_v25 }
 0x1a9   : > { %v1082_v48 = vpop.f32.mrb[84].mxu0  ;;  %v1319_v11 = vpop.f32.mrb[84].mxu1 }
 0x1aa   : > { %v1763_v6 = vpack.c.bf16 %v1421_v55, %v1421_v55  ;;  %v1422_v42 = vmax.f32 %v1397_v37, 0.0  ;;  %v1083_v43 = vadd.f32 %v2501_v61, %v1082_v48  ;;  %v1320_v20 = vadd.f32 %v2501_v61, %v1319_v11  ;;  %v2044_v49 = vpop.f32.mrb[85].mxu0  ;;  %v2112_v50 = vpop.f32.mrb[85].mxu1 }
 0x1ab   : > { %v1085_v24 = vpop.f32.mrb[86].mxu0  ;;  %v1322_v62 = vpop.f32.mrb[86].mxu1  ;;  %v2922_v50 = vmax.f32 %v2672_v18, %v2675_v30 }
 0x1ac   : > { %1548 = vst.msk [vmem:[%s2717_s10 + $0x38] sm:$0xf] %vm1533_vm1, %v1763_v6  ;;  %v1764_v1 = vpack.c.bf16 %v1422_v42, %v1422_v42  ;;  %v1373_v31 = vmax.f32 %v1083_v43, %v1320_v20  ;;  %v1086_v19 = vadd.f32 %v2501_v61, %v1085_v24  ;;  %v1323_v23 = vadd.f32 %v2501_v61, %v1322_v62  ;;  %v2045_v13 = vpop.f32.mrb[87].mxu0  ;;  %v2113_v16 = vpop.f32.mrb[87].mxu1 }
 0x1ad   : > { %v2921_v42 = vmax.f32 %v2664_v60, %v2667_v54 }
 0x1ae   : > { %1549 = vst.msk [vmem:[%s2717_s10 + $0x3c] sm:$0xf] %vm1533_vm1, %v1764_v1  ;;  %v1398_v26 = vmax.f32 %v2917_v58, %v1373_v31  ;;  %v1374_v27 = vmax.f32 %v1086_v19, %v1323_v23 }
 0x1b0   : > { %v1423_v0 = vmax.f32 %v1398_v26, 0.0  ;;  %v1399_v53 = vmax.f32 %v2918_v2, %v1374_v27 }
 0x1b1   : > { %v1090_v28 = vpop.f32.mrb[88].mxu0  ;;  %v1327_v29 = vpop.f32.mrb[88].mxu1 }
 0x1b2   : > { %v1765_v9 = vpack.c.bf16 %v1423_v0, %v1423_v0  ;;  %v1424_v35 = vmax.f32 %v1399_v53, 0.0  ;;  %v1091_v36 = vadd.f32 %v2501_v61, %v1090_v28  ;;  %v1328_v7 = vadd.f32 %v2501_v61, %v1327_v29  ;;  %v2048_v8 = vpop.f32.mrb[89].mxu0  ;;  %v2116_v14 = vpop.f32.mrb[89].mxu1 }
 0x1b3   : > { %v1093_v15 = vpop.f32.mrb[90].mxu0  ;;  %v1330_v44 = vpop.f32.mrb[90].mxu1  ;;  %v2923_v53 = vmax.f32 %v2680_v47, %v2683_v59 }
 0x1b4   : > { %1550 = vst.msk [vmem:[%s2717_s10 + $0x40] sm:$0xf] %vm1533_vm1, %v1765_v9  ;;  %v1766_v45 = vpack.c.bf16 %v1424_v35, %v1424_v35  ;;  %v1375_v33 = vmax.f32 %v1091_v36, %v1328_v7  ;;  %v1094_v5 = vadd.f32 %v2501_v61, %v1093_v15  ;;  %v1331_v10 = vadd.f32 %v2501_v61, %v1330_v44  ;;  %v2049_v21 = vpop.f32.mrb[91].mxu0  ;;  %v2117_v56 = vpop.f32.mrb[91].mxu1  ;;  %v2924_v35 = vld [vmem:[#allocation2_spill] sm:$0xff]  ;;  %v2925_v36 = vld [vmem:[#allocation3_spill] sm:$0xff] }
 0x1b5   : > { %v2926_v7 = vmax.f32 %v2924_v35, %v2925_v36 }
 0x1b6   : > { %1551 = vst.msk [vmem:[%s2717_s10 + $0x44] sm:$0xf] %vm1533_vm1, %v1766_v45  ;;  %v1400_v22 = vmax.f32 %v2919_v57, %v1375_v33  ;;  %v1376_v38 = vmax.f32 %v1094_v5, %v1331_v10 }
 0x1b8   : > { %v1425_v40 = vmax.f32 %v1400_v22, 0.0  ;;  %v1401_v51 = vmax.f32 %v2920_v3, %v1376_v38  ;;  %v2928_v3 = vld [vmem:[#allocation5_spill] sm:$0xff] }
 0x1b9   : > { %v1098_v52 = vpop.f32.mrb[92].mxu0  ;;  %v1335_v4 = vpop.f32.mrb[92].mxu1 }
 0x1ba   : > { %v1767_v39 = vpack.c.bf16 %v1425_v40, %v1425_v40  ;;  %v1426_v32 = vmax.f32 %v1401_v51, 0.0  ;;  %v1099_v34 = vadd.f32 %v2501_v61, %v1098_v52  ;;  %v1336_v25 = vadd.f32 %v2501_v61, %v1335_v4  ;;  %v2052_v55 = vpop.f32.mrb[93].mxu0  ;;  %v2120_v63 = vpop.f32.mrb[93].mxu1  ;;  %v2927_v40 = vld [vmem:[#allocation4_spill] sm:$0xff] }
 0x1bb   : > { %v1101_v37 = vpop.f32.mrb[94].mxu0  ;;  %v1338_v41 = vpop.f32.mrb[94].mxu1  ;;  %v2929_v51 = vmax.f32 %v2927_v40, %v2928_v3 }
 0x1bc   : > { %1552 = vst.msk [vmem:[%s2717_s10 + $0x48] sm:$0xf] %vm1533_vm1, %v1767_v39  ;;  %v1768_v46 = vpack.c.bf16 %v1426_v32, %v1426_v32  ;;  %v1377_v48 = vmax.f32 %v1099_v34, %v1336_v25  ;;  %v1102_v12 = vadd.f32 %v2501_v61, %v1101_v37  ;;  %v1339_v17 = vadd.f32 %v2501_v61, %v1338_v41  ;;  %v2053_v11 = vpop.f32.mrb[95].mxu0  ;;  %v2121_v6 = vpop.f32.mrb[95].mxu1 }
 0x1be   : > { %1553 = vst.msk [vmem:[%s2717_s10 + $0x4c] sm:$0xf] %vm1533_vm1, %v1768_v46  ;;  %v1402_v43 = vmax.f32 %v2921_v42, %v1377_v48  ;;  %v1378_v20 = vmax.f32 %v1102_v12, %v1339_v17 }
 0x1c0   : > { %v1427_v49 = vmax.f32 %v1402_v43, 0.0  ;;  %v1403_v24 = vmax.f32 %v2922_v50, %v1378_v20 }
 0x1c1   : > { %v1106_v62 = vpop.f32.mrb[96].mxu0  ;;  %v1343_v1 = vpop.f32.mrb[96].mxu1 }
 0x1c2   : > { %v1769_v31 = vpack.c.bf16 %v1427_v49, %v1427_v49  ;;  %v1428_v19 = vmax.f32 %v1403_v24, 0.0  ;;  %v1107_v23 = vadd.f32 %v2501_v61, %v1106_v62  ;;  %v1344_v13 = vadd.f32 %v2501_v61, %v1343_v1  ;;  %v2056_v16 = vpop.f32.mrb[97].mxu0  ;;  %v2124_v58 = vpop.f32.mrb[97].mxu1 }
 0x1c3   : > { %v1109_v26 = vpop.f32.mrb[98].mxu0  ;;  %v1346_v60 = vpop.f32.mrb[98].mxu1 }
 0x1c4   : > { %1554 = vst.msk [vmem:[%s2717_s10 + $0x50] sm:$0xf] %vm1533_vm1, %v1769_v31  ;;  %v1770_v54 = vpack.c.bf16 %v1428_v19, %v1428_v19  ;;  %v1379_v27 = vmax.f32 %v1107_v23, %v1344_v13  ;;  %v1110_v18 = vadd.f32 %v2501_v61, %v1109_v26  ;;  %v1347_v30 = vadd.f32 %v2501_v61, %v1346_v60  ;;  %v2057_v0 = vpop.f32.mrb[99].mxu0  ;;  %v2125_v2 = vpop.f32.mrb[99].mxu1 }
 0x1c6   : > { %1555 = vst.msk [vmem:[%s2717_s10 + $0x54] sm:$0xf] %vm1533_vm1, %v1770_v54  ;;  %v1404_v28 = vmax.f32 %v2923_v53, %v1379_v27  ;;  %v1380_v29 = vmax.f32 %v1110_v18, %v1347_v30 }
 0x1c8   : > { %v1429_v9 = vmax.f32 %v1404_v28, 0.0  ;;  %v1405_v8 = vmax.f32 %v2926_v7, %v1380_v29 }
 0x1c9   : > { %v1114_v14 = vpop.f32.mrb[100].mxu0  ;;  %v1351_v15 = vpop.f32.mrb[100].mxu1 }
 0x1ca   : > { %v1771_v44 = vpack.c.bf16 %v1429_v9, %v1429_v9  ;;  %v1430_v45 = vmax.f32 %v1405_v8, 0.0  ;;  %v1115_v33 = vadd.f32 %v2501_v61, %v1114_v14  ;;  %v1352_v5 = vadd.f32 %v2501_v61, %v1351_v15  ;;  %v2060_v10 = vpop.f32.mrb[101].mxu0  ;;  %v2128_v21 = vpop.f32.mrb[101].mxu1 }
 0x1cb   : > { %v1117_v47 = vpop.f32.mrb[102].mxu0  ;;  %v1354_v59 = vpop.f32.mrb[102].mxu1 }
 0x1cc   : > { %1556 = vst.msk [vmem:[%s2717_s10 + $0x58] sm:$0xf] %vm1533_vm1, %v1771_v44  ;;  %v1772_v56 = vpack.c.bf16 %v1430_v45, %v1430_v45  ;;  %v1381_v57 = vmax.f32 %v1115_v33, %v1352_v5  ;;  %v2061_v22 = vpop.f32.mrb[103].mxu0  ;;  %v2129_v38 = vpop.f32.mrb[103].mxu1 }
 0x1ce   : > { %1557 = vst.msk [vmem:[%s2717_s10 + $0x5c] sm:$0xf] %vm1533_vm1, %v1772_v56  ;;  %v1406_v52 = vmax.f32 %v2929_v51, %v1381_v57 }
 0x1d0   : > { %v1431_v4 = vmax.f32 %v1406_v52, 0.0 }
 0x1d2   : > { %v1773_v39 = vpack.c.bf16 %v1431_v4, %v1431_v4 }
 0x1d4   : > { %1559 = vst.msk [vmem:[%s2717_s10 + $0x60] sm:$0x3] %vm1558_vm2, %v1773_v39 }
 0x1d5 PF: > { %s16_s21 = sadd.s32 1, %s2207_s21  }
 0x1d6   : > { %p13_p4 = scmp.ge.s32.totalorder %s16_s21, 4  }
 0x1d8   :  { %15 = sbr.rel (!%p13_p4) target bundleno = 1 (0x1), region = 83 }

// kernel: convnet_forward.4
= control target key start
LH: loop header
LB: loop body
LE: loop exit
PB: predicated region body
PF: predicated region fallthrough
CT: control target
= control target key end

     0   :  { %s1139_s21 = smov 0   ;;  %s1319_s0 = inlined_call_operand.vmem [shape: bf16[2,25,256], index: 0, kind: input, shape index: {}]   ;;  %s1320_s1 = inlined_call_operand.vmem [shape: bf16[2,25,256], index: 1, kind: input, shape index: {}]   ;;  %s1321_s2 = inlined_call_operand.vmem [shape: bf16[2,25,256], index: 2, kind: input, shape index: {}]   ;;  %s1322_s3 = inlined_call_operand.vmem [shape: bf16[2,25,256], index: 3, kind: input, shape index: {}]   ;;  %s1323_s4 = inlined_call_operand.vmem [shape: bf16[256,128], index: 4, kind: input, shape index: {}]   ;;  %s1324_s5 = inlined_call_operand.vmem [shape: f32[1,128], index: 5, kind: input, shape index: {}]   ;;  %s1325_s6 = inlined_call_operand.vmem [shape: bf16[2,25,16], index: 6, kind: output, shape index: {}]  }
   0x1 LB: > { %s873_s22 = sadd.s32 4294967295, %s1102_s21   ;;  %p877_p0 = scmp.ge.s32.totalorder %s1102_s21, 1  ;;  %s1102_s21 = sphi %s1139_s21, %s16_s21  }
   0x2   : > { %p242_p1 = scmp.lt.s32.totalorder %s1102_s21, 3 }
   0x4   : > { %p243_p2 = pnand %p877_p0, %p242_p1 }
   0x5   : > { %v1056_v0 = vld [vmem:[%s1323_s4 + $0x40] sm:$0xff] (!%p243_p2)   ;;  %v1158_v2 = vld [vmem:[%s1323_s4 + $0x48] sm:$0xff] (!%p243_p2)   ;;  %p287_p3 = scmp.lt.s32.totalorder (!%p243_p2), %s873_s22, 1  ;;  %v1172_v4 = vld [vmem:[%s1323_s4 + $0x50] sm:$0xff] (!%p243_p2)   ;;  %vm772_vm0 = vcmask (!%p243_p2), 125952   ;;  %vm776_vm1 = vcmask (!%p243_p2), 122880  }
   0x6   : > { %246 = sbr.rel (%p243_p2) target bundleno = 308 (0x134), region = 44  ;;  %v1153_v1 = vld [vmem:[%s1323_s4] sm:$0xff] (!%p243_p2)   ;;  %936 = vmatprep.subr.bf16.mxu0 (!%p243_p2), %v1056_v0  ;;  %964 = vmatprep.subr.bf16.mxu1 (!%p243_p2), %v1056_v0  ;;  %v1165_v3 = vld [vmem:[%s1323_s4 + $0x8] sm:$0xff] (!%p243_p2)   ;;  %v1179_v5 = vld [vmem:[%s1323_s4 + $0x10] sm:$0xff] (!%p243_p2)   ;;  %vm777_vm2 = vsmask.f32 (!%p243_p2), 256 }
   0x7   : > { %937 = vmatpush3.bf16.msra.mxu0 (!%p243_p2), %v1153_v1  ;;  %965 = vmatpush3.bf16.msra.mxu1 (!%p243_p2), %v1153_v1  ;;  %v1188_v6 = vld [vmem:[%s1323_s4 + $0x58] sm:$0xff] (!%p243_p2)   ;;  %v1203_v8 = vld [vmem:[%s1323_s4 + $0x60] sm:$0xff] (!%p243_p2)   ;;  %v1066_v10 = vld [vmem:[%s1323_s4 + $0x68] sm:$0xff] (!%p243_p2)  }
   0x8   : > { %938 = vmatprep.subr.bf16.mxu0 (!%p243_p2), %v1158_v2  ;;  %966 = vmatprep.subr.bf16.mxu1 (!%p243_p2), %v1158_v2  ;;  %v1195_v7 = vld [vmem:[%s1323_s4 + $0x18] sm:$0xff] (!%p243_p2)   ;;  %v1215_v9 = vld [vmem:[%s1323_s4 + $0x20] sm:$0xff] (!%p243_p2)   ;;  %v1067_v13 = vld [vmem:[%s1323_s4 + $0x28] sm:$0xff] (!%p243_p2)  }
   0x9   : > { %v1068_v14 = vld [vmem:[%s1323_s4 + $0x70] sm:$0xff] (!%p243_p2)   ;;  %v1070_v16 = vld [vmem:[%s1323_s4 + $0x78] sm:$0xff] (!%p243_p2)   ;;  %v1291_v34 = vld [vmem:[%s1324_s5] ss:$0 sm:$0xff] (!%p243_p2) }
   0xa   : > { %v1069_v15 = vld [vmem:[%s1323_s4 + $0x30] sm:$0xff] (!%p243_p2)   ;;  %v1071_v17 = vld [vmem:[%s1323_s4 + $0x38] sm:$0xff] (!%p243_p2)   ;;  %vm778_vm3 = vmand (!%p243_p2), %vm776_vm1, %vm777_vm2 }
   0xb   : > { %939 = vmatpush3.bf16.msra.mxu0 (!%p243_p2), %v1165_v3  ;;  %967 = vmatpush3.bf16.msra.mxu1 (!%p243_p2), %v1165_v3 }
   0xc   : > { %940 = vmatprep.subr.bf16.mxu0 (!%p243_p2), %v1172_v4  ;;  %968 = vmatprep.subr.bf16.mxu1 (!%p243_p2), %v1172_v4 }
   0xd   : > { %s1327_s22 = smov (!%p287_p3, %s873_s22), 1 }
   0xe   : > { %s927_s15 = sshll.u32 %s1327_s22, 5  ;;  %s931_s26 = sshll.u32 %s1327_s22, 4 }
   0xf   : > { %941 = vmatpush3.bf16.msra.mxu0 %v1179_v5  ;;  %969 = vmatpush3.bf16.msra.mxu1 %v1179_v5  ;;  %s1208_s20 = scalar_lea.vmem %s1319_s0, %s927_s15  ;;  %s1220_s27 = scalar_lea.vmem %s1320_s1, %s927_s15 }
  0x10   : > { %942 = vmatprep.subr.bf16.mxu0 %v1188_v6  ;;  %970 = vmatprep.subr.bf16.mxu1 %v1188_v6  ;;  %v1074_v11 = vld [vmem:[%s1208_s20 + $0x4] ss:$8 sps:$4 sm:$0xff]   ;;  %s1237_s10 = scalar_lea.vmem %s1321_s2, %s927_s15  ;;  %s1245_s16 = scalar_lea.vmem %s1322_s3, %s927_s15  ;;  %v1072_v18 = vld [vmem:[%s1208_s20] ss:$8 sps:$4 sm:$0xff]  }
  0x11   : > { %v1077_v12 = vld [vmem:[%s1220_s27 + $0x4] ss:$8 sps:$4 sm:$0xff]   ;;  %504 = vmatprep.mubr.bf16.mxu0 %v1074_v11  ;;  %v1075_v19 = vld [vmem:[%s1220_s27] ss:$8 sps:$4 sm:$0xff]   ;;  %s311_s29 = scalar_lea.vmem %s1325_s6, %s931_s26 }
  0x12   : > { %577 = vmatprep.mubr.bf16.mxu1 %v1077_v12  ;;  %v1078_v20 = vld [vmem:[%s1208_s20 + $0x14] ss:$8 sps:$4 sm:$0x1f]   ;;  %v1082_v22 = vld [vmem:[%s1208_s20 + $0x10] ss:$8 sps:$4 sm:$0x1f]  }
  0x13   : > { %943 = vmatpush3.bf16.msra.mxu0 %v1195_v7  ;;  %971 = vmatpush3.bf16.msra.mxu1 %v1195_v7  ;;  %v1080_v21 = vld [vmem:[%s1220_s27 + $0x14] ss:$8 sps:$4 sm:$0x1f]   ;;  %v1083_v23 = vld [vmem:[%s1220_s27 + $0x10] ss:$8 sps:$4 sm:$0x1f]  }
  0x14   : > { %944 = vmatprep.subr.bf16.mxu0 %v1203_v8  ;;  %972 = vmatprep.subr.bf16.mxu1 %v1203_v8  ;;  %v1086_v24 = vld [vmem:[%s1237_s10 + $0x4] ss:$8 sps:$4 sm:$0xff]   ;;  %v1084_v26 = vld [vmem:[%s1237_s10] ss:$8 sps:$4 sm:$0xff]  }
  0x15   : > { %v1089_v25 = vld [vmem:[%s1245_s16 + $0x4] ss:$8 sps:$4 sm:$0xff]   ;;  %v1087_v27 = vld [vmem:[%s1245_s16] ss:$8 sps:$4 sm:$0xff]  }
  0x16   : > { %v1090_v28 = vld [vmem:[%s1237_s10 + $0x14] ss:$8 sps:$4 sm:$0x1f]   ;;  %v1094_v30 = vld [vmem:[%s1237_s10 + $0x10] ss:$8 sps:$4 sm:$0x1f]  }
  0x17   : > { %945 = vmatpush3.bf16.msra.mxu0 %v1215_v9  ;;  %973 = vmatpush3.bf16.msra.mxu1 %v1215_v9  ;;  %v1092_v29 = vld [vmem:[%s1245_s16 + $0x14] ss:$8 sps:$4 sm:$0x1f]   ;;  %v1095_v31 = vld [vmem:[%s1245_s16 + $0x10] ss:$8 sps:$4 sm:$0x1f]  }
  0x18   : > { %946 = vmatprep.subr.bf16.mxu0 %v1066_v10  ;;  %974 = vmatprep.subr.bf16.mxu1 %v1066_v10 }
  0x1b   : > { %947 = vmatpush3.bf16.msra.mxu0 %v1067_v13  ;;  %975 = vmatpush3.bf16.msra.mxu1 %v1067_v13 }
  0x1c   : > { %948 = vmatprep.subr.bf16.mxu0 %v1068_v14  ;;  %976 = vmatprep.subr.bf16.mxu1 %v1068_v14 }
  0x1f   : > { %949 = vmatpush3.bf16.msra.mxu0 %v1069_v15  ;;  %977 = vmatpush3.bf16.msra.mxu1 %v1069_v15 }
  0x20   : > { %950 = vmatprep.subr.bf16.mxu0 %v1070_v16  ;;  %978 = vmatprep.subr.bf16.mxu1 %v1070_v16 }
  0x23   : > { %951 = vmatpush3.bf16.msra.mxu0 %v1071_v17  ;;  %979 = vmatpush3.bf16.msra.mxu1 %v1071_v17 }
  0x24   : > { %992 = vmatprep.subr.bf16.mxu0 %v1056_v0  ;;  %1020 = vmatprep.subr.bf16.mxu1 %v1056_v0 }
  0x26   : > { %505 = vmatmul.mubr.bf16.vlgmr.msra.gmra.mrb[0].mxu0 %v1072_v18  ;;  %578 = vmatmul.mubr.bf16.vlgmr.msra.gmra.mrb[0].mxu1 %v1075_v19 }
  0x27   : > { %993 = vmatpush3.bf16.msra.mxu0 %v1153_v1  ;;  %1021 = vmatpush3.bf16.msra.mxu1 %v1153_v1 }
  0x28   : > { %994 = vmatprep.subr.bf16.mxu0 %v1158_v2  ;;  %1022 = vmatprep.subr.bf16.mxu1 %v1158_v2 }
  0x29   : > { %512 = vmatprep.mubr.bf16.mxu0 %v1078_v20  ;;  %585 = vmatprep.mubr.bf16.mxu1 %v1080_v21 }
  0x2b   : > { %995 = vmatpush3.bf16.msra.mxu0 %v1165_v3  ;;  %1023 = vmatpush3.bf16.msra.mxu1 %v1165_v3 }
  0x2c   : > { %996 = vmatprep.subr.bf16.mxu0 %v1172_v4  ;;  %1024 = vmatprep.subr.bf16.mxu1 %v1172_v4 }
  0x2e   : > { %513 = vmatmul.mubr.bf16.gmra.mrb[4].mxu0 %v1082_v22  ;;  %586 = vmatmul.mubr.bf16.gmra.mrb[4].mxu1 %v1083_v23 }
  0x2f   : > { %997 = vmatpush3.bf16.msra.mxu0 %v1179_v5  ;;  %1025 = vmatpush3.bf16.msra.mxu1 %v1179_v5 }
  0x30   : > { %998 = vmatprep.subr.bf16.mxu0 %v1188_v6  ;;  %1026 = vmatprep.subr.bf16.mxu1 %v1188_v6 }
  0x31   : > { %654 = vmatprep.mubr.bf16.mxu0 %v1086_v24  ;;  %727 = vmatprep.mubr.bf16.mxu1 %v1089_v25 }
  0x33   : > { %999 = vmatpush3.bf16.msra.mxu0 %v1195_v7  ;;  %1027 = vmatpush3.bf16.msra.mxu1 %v1195_v7 }
  0x34   : > { %1000 = vmatprep.subr.bf16.mxu0 %v1203_v8  ;;  %1028 = vmatprep.subr.bf16.mxu1 %v1203_v8 }
  0x37   : > { %1001 = vmatpush3.bf16.msra.mxu0 %v1215_v9  ;;  %1029 = vmatpush3.bf16.msra.mxu1 %v1215_v9 }
  0x38   : > { %1002 = vmatprep.subr.bf16.mxu0 %v1066_v10  ;;  %1030 = vmatprep.subr.bf16.mxu1 %v1066_v10 }
  0x3b   : > { %1003 = vmatpush3.bf16.msra.mxu0 %v1067_v13  ;;  %1031 = vmatpush3.bf16.msra.mxu1 %v1067_v13 }
  0x3c   : > { %1004 = vmatprep.subr.bf16.mxu0 %v1068_v14  ;;  %1032 = vmatprep.subr.bf16.mxu1 %v1068_v14 }
  0x3f   : > { %1005 = vmatpush3.bf16.msra.mxu0 %v1069_v15  ;;  %1033 = vmatpush3.bf16.msra.mxu1 %v1069_v15 }
  0x40   : > { %1006 = vmatprep.subr.bf16.mxu0 %v1070_v16  ;;  %1034 = vmatprep.subr.bf16.mxu1 %v1070_v16 }
  0x43   : > { %1007 = vmatpush3.bf16.msra.mxu0 %v1071_v17  ;;  %1035 = vmatpush3.bf16.msra.mxu1 %v1071_v17 }
  0x46   : > { %655 = vmatmul.mubr.bf16.vlgmr.msra.gmra.mrb[8].mxu0 %v1084_v26  ;;  %728 = vmatmul.mubr.bf16.vlgmr.msra.gmra.mrb[8].mxu1 %v1087_v27 }
  0x47   : > { %662 = vmatprep.mubr.bf16.mxu0 %v1090_v28  ;;  %735 = vmatprep.mubr.bf16.mxu1 %v1092_v29 }
  0x4e   : > { %663 = vmatmul.mubr.bf16.gmra.mrb[12].mxu0 %v1094_v30  ;;  %736 = vmatmul.mubr.bf16.gmra.mrb[12].mxu1 %v1095_v31 }
  0xf9   : > { %v952_v32 = vpop.f32.mrb[0].mxu0  ;;  %v980_v33 = vpop.f32.mrb[0].mxu1 }
  0xfa   : > { %v953_v35 = vpop.f32.mrb[1].mxu0  ;;  %v981_v36 = vpop.f32.mrb[1].mxu1 }
  0xfb   : > { %v954_v37 = vadd.f32 %v953_v35, %v952_v32  ;;  %v982_v38 = vadd.f32 %v981_v36, %v980_v33  ;;  %v955_v39 = vpop.f32.mrb[2].mxu0  ;;  %v983_v40 = vpop.f32.mrb[2].mxu1 }
  0xfc   : > { %v956_v41 = vpop.f32.mrb[3].mxu0  ;;  %v984_v42 = vpop.f32.mrb[3].mxu1 }
  0xfd   : > { %v507_v43 = vadd.f32 %v954_v37, %v1291_v34  ;;  %v580_v44 = vadd.f32 %v982_v38, %v1291_v34  ;;  %v957_v45 = vadd.f32 %v956_v41, %v955_v39  ;;  %v985_v46 = vadd.f32 %v984_v42, %v983_v40 }
  0xff   : > { %v594_v47 = vmax.f32 %v507_v43, %v580_v44  ;;  %v510_v48 = vadd.f32 %v957_v45, %v1291_v34  ;;  %v583_v49 = vadd.f32 %v985_v46, %v1291_v34 }
 0x101   : > { %v595_v50 = vmax.f32 %v510_v48, %v583_v49  ;;  %v958_v51 = vpop.f32.mrb[4].mxu0  ;;  %v986_v52 = vpop.f32.mrb[4].mxu1 }
 0x102   : > { %v959_v53 = vpop.f32.mrb[5].mxu0  ;;  %v987_v54 = vpop.f32.mrb[5].mxu1 }
 0x103   : > { %v960_v55 = vadd.f32 %v959_v53, %v958_v51  ;;  %v988_v56 = vadd.f32 %v987_v54, %v986_v52  ;;  %v961_v57 = vpop.f32.mrb[6].mxu0  ;;  %v989_v58 = vpop.f32.mrb[6].mxu1  ;;  %v779_v53 = vld [vmem:[%s311_s29 + $0xc] sm:$0x1] }
 0x104   : > { %v962_v59 = vpop.f32.mrb[7].mxu0  ;;  %v990_v60 = vpop.f32.mrb[7].mxu1 }
 0x105   : > { %v515_v61 = vadd.f32 %v960_v55, %v1291_v34  ;;  %v588_v62 = vadd.f32 %v988_v56, %v1291_v34  ;;  %v963_v63 = vadd.f32 %v962_v59, %v961_v57  ;;  %v991_v0 = vadd.f32 %v990_v60, %v989_v58 }
 0x107   : > { %v596_v1 = vmax.f32 %v515_v61, %v588_v62  ;;  %v518_v2 = vadd.f32 %v963_v63, %v1291_v34  ;;  %v591_v3 = vadd.f32 %v991_v0, %v1291_v34 }
 0x109   : > { %v597_v4 = vmax.f32 %v518_v2, %v591_v3 }
 0x119   : > { %v1008_v5 = vpop.f32.mrb[8].mxu0  ;;  %v1036_v6 = vpop.f32.mrb[8].mxu1 }
 0x11a   : > { %v1009_v7 = vpop.f32.mrb[9].mxu0  ;;  %v1037_v8 = vpop.f32.mrb[9].mxu1 }
 0x11b   : > { %v1010_v9 = vadd.f32 %v1009_v7, %v1008_v5  ;;  %v1038_v10 = vadd.f32 %v1037_v8, %v1036_v6  ;;  %v1011_v11 = vpop.f32.mrb[10].mxu0  ;;  %v1039_v12 = vpop.f32.mrb[10].mxu1 }
 0x11c   : > { %v1012_v13 = vpop.f32.mrb[11].mxu0  ;;  %v1040_v14 = vpop.f32.mrb[11].mxu1 }
 0x11d   : > { %v657_v15 = vadd.f32 %v1010_v9, %v1291_v34  ;;  %v730_v16 = vadd.f32 %v1038_v10, %v1291_v34  ;;  %v1013_v17 = vadd.f32 %v1012_v13, %v1011_v11  ;;  %v1041_v18 = vadd.f32 %v1040_v14, %v1039_v12 }
 0x11f   : > { %v744_v19 = vmax.f32 %v657_v15, %v730_v16  ;;  %v660_v20 = vadd.f32 %v1013_v17, %v1291_v34  ;;  %v733_v21 = vadd.f32 %v1041_v18, %v1291_v34 }
 0x121   : > { %v748_v22 = vmax.f32 %v594_v47, %v744_v19  ;;  %v745_v23 = vmax.f32 %v660_v20, %v733_v21  ;;  %v1014_v24 = vpop.f32.mrb[12].mxu0  ;;  %v1042_v25 = vpop.f32.mrb[12].mxu1 }
 0x122   : > { %v1015_v26 = vpop.f32.mrb[13].mxu0  ;;  %v1043_v27 = vpop.f32.mrb[13].mxu1 }
 0x123   : > { %v752_v28 = vmax.f32 %v748_v22, 0.0  ;;  %v749_v29 = vmax.f32 %v595_v50, %v745_v23  ;;  %v1016_v30 = vadd.f32 %v1015_v26, %v1014_v24  ;;  %v1044_v31 = vadd.f32 %v1043_v27, %v1042_v25  ;;  %v1017_v32 = vpop.f32.mrb[14].mxu0  ;;  %v1045_v33 = vpop.f32.mrb[14].mxu1 }
 0x124   : > { %v1018_v35 = vpop.f32.mrb[15].mxu0  ;;  %v1046_v36 = vpop.f32.mrb[15].mxu1 }
 0x125   : > { %v932_v37 = vpack.c.bf16 %v752_v28, %v752_v28  ;;  %v753_v38 = vmax.f32 %v749_v29, 0.0  ;;  %v665_v39 = vadd.f32 %v1016_v30, %v1291_v34  ;;  %v738_v40 = vadd.f32 %v1044_v31, %v1291_v34 }
 0x126   : > { %v1019_v41 = vadd.f32 %v1018_v35, %v1017_v32  ;;  %v1047_v42 = vadd.f32 %v1046_v36, %v1045_v33 }
 0x127   : > { %773 = vst.msk [vmem:[%s311_s29] sm:$0xf] %vm772_vm0, %v932_v37  ;;  %v933_v43 = vpack.c.bf16 %v753_v38, %v753_v38  ;;  %v746_v44 = vmax.f32 %v665_v39, %v738_v40 }
 0x128   : > { %v668_v45 = vadd.f32 %v1019_v41, %v1291_v34  ;;  %v741_v46 = vadd.f32 %v1047_v42, %v1291_v34 }
 0x129   : > { %774 = vst.msk [vmem:[%s311_s29 + $0x4] sm:$0xf] %vm772_vm0, %v933_v43  ;;  %v750_v47 = vmax.f32 %v596_v1, %v746_v44 }
 0x12a   : > { %v747_v48 = vmax.f32 %v668_v45, %v741_v46 }
 0x12b   : > { %v754_v49 = vmax.f32 %v750_v47, 0.0 }
 0x12c   : > { %v751_v50 = vmax.f32 %v597_v4, %v747_v48 }
 0x12d   : > { %v934_v51 = vpack.c.bf16 %v754_v49, %v754_v49 }
 0x12e   : > { %v755_v52 = vmax.f32 %v751_v50, 0.0 }
 0x12f   : > { %775 = vst.msk [vmem:[%s311_s29 + $0x8] sm:$0xf] %vm772_vm0, %v934_v51 }
 0x130   : > { %v935_v54 = vpack.c.bf16 %v755_v52, %v755_v52 }
 0x132   : > { %v780_v55 = vsel %vm778_vm3, %v935_v54, %v779_v53 }
 0x133   : > { %781 = vst [vmem:[%s311_s29 + $0xc] sm:$0x1] %v780_v55 }
 0x134 PF: > { %s16_s21 = sadd.s32 1, %s1102_s21  }
 0x135   : > { %p13_p4 = scmp.ge.s32.totalorder %s16_s21, 4  }
 0x137   :  { %15 = sbr.rel (!%p13_p4) target bundleno = 1 (0x1), region = 83 }

// kernel: convnet_forward.5
= control target key start
LH: loop header
LB: loop body
LE: loop exit
PB: predicated region body
PF: predicated region fallthrough
CT: control target
= control target key end

     0   :  { %v828_v39 = vmov 0.0   ;;  %vm829_vm0 = vmmov 0   ;;  %s1050_s1 = inlined_call_operand.vmem [shape: bf16[512,128], index: 1, kind: input, shape index: {}]   ;;  %s1051_s0 = inlined_call_operand.vmem [shape: bf16[8,512], index: 0, kind: input, shape index: {}]   ;;  %s1052_s3 = inlined_call_operand.vmem [shape: bf16[128,128], index: 3, kind: input, shape index: {}]   ;;  %s1053_s5 = inlined_call_operand.vmem [shape: bf16[128,128], index: 5, kind: input, shape index: {}]   ;;  %s1054_s2 = inlined_call_operand.vmem [shape: f32[1,128], index: 2, kind: input, shape index: {}]   ;;  %s1055_s4 = inlined_call_operand.vmem [shape: f32[1,128], index: 4, kind: input, shape index: {}]   ;;  %s1056_s6 = inlined_call_operand.vmem [shape: f32[1,128], index: 6, kind: input, shape index: {}]   ;;  %s1057_s7 = inlined_call_operand.vmem [shape: f32[8,128], index: 7, kind: output, shape index: {}]  }
   0x1   :  { %v776_v0 = vld [vmem:[%s1050_s1 + $0x40] sm:$0xff]   ;;  %v780_v4 = vld [vmem:[%s1050_s1 + $0x48] sm:$0xff]   ;;  %v784_v8 = vld [vmem:[%s1050_s1 + $0x50] sm:$0xff]  }
   0x2   :  { %v777_v1 = vld [vmem:[%s1050_s1 + $0xc0] sm:$0xff]   ;;  %672 = vmatprep.subr.bf16.mxu0 %v776_v0  ;;  %v781_v5 = vld [vmem:[%s1050_s1 + $0xc8] sm:$0xff]   ;;  %v785_v9 = vld [vmem:[%s1050_s1 + $0xd0] sm:$0xff]  }
   0x3   :  { %v778_v2 = vld [vmem:[%s1050_s1] sm:$0xff]   ;;  %694 = vmatprep.subr.bf16.mxu1 %v777_v1  ;;  %v782_v6 = vld [vmem:[%s1050_s1 + $0x8] sm:$0xff]   ;;  %v786_v10 = vld [vmem:[%s1050_s1 + $0x10] sm:$0xff]  }
   0x4   :  { %v779_v3 = vld [vmem:[%s1050_s1 + $0x80] sm:$0xff]   ;;  %673 = vmatpush3.bf16.msra.mxu0 %v778_v2  ;;  %v783_v7 = vld [vmem:[%s1050_s1 + $0x88] sm:$0xff]   ;;  %v787_v11 = vld [vmem:[%s1050_s1 + $0x90] sm:$0xff]  }
   0x5   :  { %695 = vmatpush3.bf16.msra.mxu1 %v779_v3  ;;  %674 = vmatprep.subr.bf16.mxu0 %v780_v4  ;;  %v788_v12 = vld [vmem:[%s1050_s1 + $0x58] sm:$0xff]   ;;  %v792_v16 = vld [vmem:[%s1050_s1 + $0x60] sm:$0xff]   ;;  %v796_v20 = vld [vmem:[%s1050_s1 + $0x68] sm:$0xff]  }
   0x6   :  { %696 = vmatprep.subr.bf16.mxu1 %v781_v5  ;;  %v789_v13 = vld [vmem:[%s1050_s1 + $0xd8] sm:$0xff]   ;;  %v793_v17 = vld [vmem:[%s1050_s1 + $0xe0] sm:$0xff]   ;;  %v797_v21 = vld [vmem:[%s1050_s1 + $0xe8] sm:$0xff]  }
   0x7   :  { %v790_v14 = vld [vmem:[%s1050_s1 + $0x18] sm:$0xff]   ;;  %v794_v18 = vld [vmem:[%s1050_s1 + $0x20] sm:$0xff]   ;;  %v798_v22 = vld [vmem:[%s1050_s1 + $0x28] sm:$0xff]  }
   0x8   :  { %675 = vmatpush3.bf16.msra.mxu0 %v782_v6  ;;  %v791_v15 = vld [vmem:[%s1050_s1 + $0x98] sm:$0xff]   ;;  %v795_v19 = vld [vmem:[%s1050_s1 + $0xa0] sm:$0xff]   ;;  %v799_v23 = vld [vmem:[%s1050_s1 + $0xa8] sm:$0xff]  }
   0x9   :  { %697 = vmatpush3.bf16.msra.mxu1 %v783_v7  ;;  %676 = vmatprep.subr.bf16.mxu0 %v784_v8  ;;  %v800_v24 = vld [vmem:[%s1050_s1 + $0x70] sm:$0xff]   ;;  %v804_v28 = vld [vmem:[%s1050_s1 + $0x78] sm:$0xff]   ;;  %v27_v32 = vld [vmem:[%s1051_s0] sm:$0xff] }
   0xa   :  { %698 = vmatprep.subr.bf16.mxu1 %v785_v9  ;;  %v801_v25 = vld [vmem:[%s1050_s1 + $0xf0] sm:$0xff]   ;;  %v805_v29 = vld [vmem:[%s1050_s1 + $0xf8] sm:$0xff]   ;;  %v28_v33 = vld [vmem:[%s1051_s0 + $0x8] sm:$0xff]  ;;  %v618_v34 = vcombine.low %v27_v32, %v27_v32  ;;  %v619_v35 = vcombine.high %v27_v32, %v27_v32 }
   0xb   :  { %v802_v26 = vld [vmem:[%s1050_s1 + $0x30] sm:$0xff]   ;;  %v806_v30 = vld [vmem:[%s1050_s1 + $0x38] sm:$0xff]   ;;  %v620_v36 = vcombine.low %v28_v33, %v28_v33  ;;  %v621_v37 = vcombine.high %v28_v33, %v28_v33  ;;  %v812_v38 = vld [vmem:[%s1052_s3] sm:$0xff]  }
   0xc   :  { %677 = vmatpush3.bf16.msra.mxu0 %v786_v10  ;;  %v803_v27 = vld [vmem:[%s1050_s1 + $0xb0] sm:$0xff]   ;;  %v807_v31 = vld [vmem:[%s1050_s1 + $0xb8] sm:$0xff]   ;;  %338 = vmatprep.mubr.bf16.mxu0 %v619_v35  ;;  %v813_v40 = vld [vmem:[%s1052_s3 + $0x8] sm:$0xff]  }
   0xd   :  { %699 = vmatpush3.bf16.msra.mxu1 %v787_v11  ;;  %678 = vmatprep.subr.bf16.mxu0 %v788_v12  ;;  %v814_v41 = vld [vmem:[%s1052_s3 + $0x10] sm:$0xff]   ;;  %v815_v42 = vld [vmem:[%s1052_s3 + $0x18] sm:$0xff]   ;;  %v816_v43 = vld [vmem:[%s1052_s3 + $0x20] sm:$0xff]  }
   0xe   :  { %700 = vmatprep.subr.bf16.mxu1 %v789_v13  ;;  %378 = vmatprep.mubr.bf16.mxu1 %v621_v37  ;;  %v817_v44 = vld [vmem:[%s1052_s3 + $0x28] sm:$0xff]   ;;  %v818_v45 = vld [vmem:[%s1052_s3 + $0x30] sm:$0xff]   ;;  %v819_v46 = vld [vmem:[%s1052_s3 + $0x38] sm:$0xff]  }
   0xf   :  { %v820_v47 = vld [vmem:[%s1053_s5] sm:$0xff]   ;;  %v821_v48 = vld [vmem:[%s1053_s5 + $0x8] sm:$0xff]   ;;  %v822_v49 = vld [vmem:[%s1053_s5 + $0x10] sm:$0xff]  }
  0x10   :  { %679 = vmatpush3.bf16.msra.mxu0 %v790_v14  ;;  %v823_v50 = vld [vmem:[%s1053_s5 + $0x18] sm:$0xff]   ;;  %v824_v51 = vld [vmem:[%s1053_s5 + $0x20] sm:$0xff]   ;;  %v825_v52 = vld [vmem:[%s1053_s5 + $0x28] sm:$0xff]  }
  0x11   :  { %701 = vmatpush3.bf16.msra.mxu1 %v791_v15  ;;  %680 = vmatprep.subr.bf16.mxu0 %v792_v16  ;;  %v617_v55 = vld [vmem:[%s1054_s2] ss:$0 sm:$0xff]  ;;  %v826_v4 = vld [vmem:[%s1053_s5 + $0x30] sm:$0xff]   ;;  %v827_v5 = vld [vmem:[%s1053_s5 + $0x38] sm:$0xff]  }
  0x12   :  { %702 = vmatprep.subr.bf16.mxu1 %v793_v17  ;;  %v654_v6 = vld [vmem:[%s1055_s4] ss:$0 sm:$0xff] }
  0x13   :  { %v663_v14 = vld [vmem:[%s1056_s6] ss:$0 sm:$0xff] }
  0x14   :  { %681 = vmatpush3.bf16.msra.mxu0 %v794_v18 }
  0x15   :  { %703 = vmatpush3.bf16.msra.mxu1 %v795_v19  ;;  %682 = vmatprep.subr.bf16.mxu0 %v796_v20 }
  0x16   :  { %704 = vmatprep.subr.bf16.mxu1 %v797_v21 }
  0x18   :  { %683 = vmatpush3.bf16.msra.mxu0 %v798_v22 }
  0x19   :  { %705 = vmatpush3.bf16.msra.mxu1 %v799_v23  ;;  %684 = vmatprep.subr.bf16.mxu0 %v800_v24 }
  0x1a   :  { %706 = vmatprep.subr.bf16.mxu1 %v801_v25 }
  0x1c   :  { %685 = vmatpush3.bf16.msra.mxu0 %v802_v26 }
  0x1d   :  { %707 = vmatpush3.bf16.msra.mxu1 %v803_v27  ;;  %686 = vmatprep.subr.bf16.mxu0 %v804_v28 }
  0x1e   :  { %708 = vmatprep.subr.bf16.mxu1 %v805_v29 }
  0x20   :  { %687 = vmatpush3.bf16.msra.mxu0 %v806_v30 }
  0x21   :  { %709 = vmatpush3.bf16.msra.mxu1 %v807_v31  ;;  %734 = vmatprep.subr.bf16.mxu0 %v828_v39 }
  0x22   :  { %754 = vmatprep.subr.bf16.mxu1 %v828_v39 }
  0x23   :  { %339 = vmatmul.mubr.bf16.vlgmr.msra.gmra.mrb[0].mxu0 %v618_v34 }
  0x24   :  { %379 = vmatmul.mubr.bf16.vlgmr.msra.gmra.mrb[0].mxu1 %v620_v36  ;;  %735 = vmatpush3.bf16.msra.mxu0 %v812_v38 }
  0x25   :  { %736 = vmatprep.subr.bf16.mxu0 %v828_v39  ;;  %750 = vmatprep.mubr.msk.bf16.mxu0 %vm829_vm0, %v828_v39 }
  0x26   :  { %770 = vmatprep.mubr.msk.bf16.mxu1 %vm829_vm0, %v828_v39  ;;  %755 = vmatpush3.bf16.msra.mxu1 %v820_v47 }
  0x27   :  { %756 = vmatprep.subr.bf16.mxu1 %v828_v39 }
  0x28   :  { %737 = vmatpush3.bf16.msra.mxu0 %v813_v40 }
  0x29   :  { %738 = vmatprep.subr.bf16.mxu0 %v828_v39 }
  0x2a   :  { %757 = vmatpush3.bf16.msra.mxu1 %v821_v48 }
  0x2b   :  { %758 = vmatprep.subr.bf16.mxu1 %v828_v39 }
  0x2c   :  { %739 = vmatpush3.bf16.msra.mxu0 %v814_v41 }
  0x2d   :  { %740 = vmatprep.subr.bf16.mxu0 %v828_v39 }
  0x2e   :  { %759 = vmatpush3.bf16.msra.mxu1 %v822_v49 }
  0x2f   :  { %760 = vmatprep.subr.bf16.mxu1 %v828_v39 }
  0x30   :  { %741 = vmatpush3.bf16.msra.mxu0 %v815_v42 }
  0x31   :  { %742 = vmatprep.subr.bf16.mxu0 %v828_v39 }
  0x32   :  { %761 = vmatpush3.bf16.msra.mxu1 %v823_v50 }
  0x33   :  { %762 = vmatprep.subr.bf16.mxu1 %v828_v39 }
  0x34   :  { %743 = vmatpush3.bf16.msra.mxu0 %v816_v43 }
  0x35   :  { %744 = vmatprep.subr.bf16.mxu0 %v828_v39 }
  0x36   :  { %763 = vmatpush3.bf16.msra.mxu1 %v824_v51 }
  0x37   :  { %764 = vmatprep.subr.bf16.mxu1 %v828_v39 }
  0x38   :  { %745 = vmatpush3.bf16.msra.mxu0 %v817_v44 }
  0x39   :  { %746 = vmatprep.subr.bf16.mxu0 %v828_v39 }
  0x3a   :  { %765 = vmatpush3.bf16.msra.mxu1 %v825_v52 }
  0x3b   :  { %766 = vmatprep.subr.bf16.mxu1 %v828_v39 }
  0x3c   :  { %747 = vmatpush3.bf16.msra.mxu0 %v818_v45 }
  0x3d   :  { %748 = vmatprep.subr.bf16.mxu0 %v828_v39 }
  0x3e   :  { %767 = vmatpush3.bf16.msra.mxu1 %v826_v4 }
  0x3f   :  { %768 = vmatprep.subr.bf16.mxu1 %v828_v39 }
  0x40   :  { %749 = vmatpush3.bf16.msra.mxu0 %v819_v46 }
  0x42   :  { %769 = vmatpush3.bf16.msra.mxu1 %v827_v5 }
  0xf6   :  { %v688_v53 = vpop.f32.mrb[0].mxu0 }
  0xf7   :  { %v710_v54 = vpop.f32.mrb[0].mxu1  ;;  %v689_v56 = vpop.f32.mrb[1].mxu0 }
  0xf8   :  { %v711_v57 = vpop.f32.mrb[1].mxu1  ;;  %v690_v58 = vadd.f32 %v689_v56, %v688_v53  ;;  %v691_v60 = vpop.f32.mrb[2].mxu0 }
  0xf9   :  { %v712_v59 = vadd.f32 %v711_v57, %v710_v54  ;;  %v713_v61 = vpop.f32.mrb[2].mxu1  ;;  %v692_v62 = vpop.f32.mrb[3].mxu0 }
  0xfa   :  { %v714_v63 = vpop.f32.mrb[3].mxu1  ;;  %v341_v0 = vadd.f32 %v690_v58, %v617_v55 }
  0xfc   :  { %v381_v1 = vadd.f32 %v712_v59, %v341_v0 }
  0xfe   :  { %v386_v2 = vmax.f32 %v381_v1, 0.0 }
 0x100   :  { %v387_v3 = vpack.c.bf16 %v386_v2, %v386_v2 }
 0x102   :  { %751 = vmatmul.mubr.bf16.vlgmr.msra.gmra.mrb[4].mxu0 %v387_v3 }
 0x1d5   :  { %v493_v7 = vpop.f32.mrb[4].mxu0 }
 0x1d6   :  { %v494_v8 = vadd.f32 %v654_v6, %v493_v7  ;;  %v752_v9 = vpop.f32.mrb[5].mxu0 }
 0x1d7   :  { %v496_v10 = vpop.f32.mrb[6].mxu0 }
 0x1d8   :  { %v499_v11 = vmax.f32 %v494_v8, 0.0  ;;  %v753_v12 = vpop.f32.mrb[7].mxu0 }
 0x1da   :  { %v500_v13 = vpack.c.bf16 %v499_v11, %v499_v11 }
 0x1dc   :  { %771 = vmatmul.mubr.bf16.vlgmr.msra.gmra.mrb[4].mxu1 %v500_v13 }
 0x2af   :  { %v606_v15 = vpop.f32.mrb[4].mxu1 }
 0x2b0   :  { %v607_v16 = vadd.f32 %v663_v14, %v606_v15  ;;  %v772_v17 = vpop.f32.mrb[5].mxu1 }
 0x2b1   :  { %v609_v18 = vpop.f32.mrb[6].mxu1 }
 0x2b2   :  { %612 = vst [vmem:[%s1057_s7] sm:$0xff] %v607_v16  ;;  %v773_v19 = vpop.f32.mrb[7].mxu1 }

</bundles_post_ra>
